<compile_context>
chip_gen: v7x
topology: tpu7x:2x2x1
jax: 0.10.0
libtpu: 0.0.40
codegen_flags: <defaults>
</compile_context>

<pallas_src>
import functools

import jax
import jax.numpy as jnp
from jax.experimental import pallas as pl
from jax.experimental.pallas import tpu as pltpu

LN_EPS = 1e-5     # PyTorch nn.LayerNorm default
LANE = 128        # TPU lane width


def _round_up(x, m):
    return (x + m - 1) // m * m


def _vmem_estimate(bblk, L, Cp, w_itemsize, use_im2col):
    """Rough per-invocation VMEM working-set estimate (bytes)."""
    act = bblk * L * Cp * 4                        # one (Bblk, L, Cp) f32 tile
    msk = bblk * L * LANE * 4                      # (Bblk, L, 1) lane-pads to 128
    w = 3 * Cp * Cp * w_itemsize                   # one fused conv weight block
    ln = 8 * Cp * 4                                # one (1, 1, Cp) vector (sublane-padded)
    pipeline = 2 * act + 2 * act + 2 * msk + 2 * (2 * w) + 2 * (4 * ln)
    body = 8 * act                                 # carry/residual/masked/shifted/LN temps
    if use_im2col:
        body += bblk * L * 3 * Cp * max(w_itemsize, 4)   # (M, 3Cp) im2col temp
    return pipeline + body


def fused_resnet_kernel(x_ref, m_ref, w1_ref, g1_ref, b1_ref,
                        w2_ref, g2_ref, b2_ref, o_ref,
                        *, c_real, use_im2col):
    """One (batch-block, layer) grid step of the fused ProteinResnet."""
    layer = pl.program_id(1)

    # Layer 0: seed the VMEM-resident carry with the input activation.
    @pl.when(layer == 0)
    def _():
        o_ref[...] = x_ref[...]

    blk_b, L, Cp = o_ref.shape
    M = blk_b * L

    # Flatten (Bblk, L, Cp) -> (M, Cp): layout-preserving when L % 8 == 0,
    # so the conv matmul runs with M rows against the 128/256-row MXU.
    x = o_ref[...].reshape(M, Cp)      # f32 carry, resident across the layer axis
    m = m_ref[...].reshape(M, 1)       # padding mask, broadcast over channels

    # Sequence-boundary keep-masks, hoisted once and reused by both convs.
    # Built per sequence so the sublane roll never leaks across batch rows.
    pos = jax.lax.broadcasted_iota(jnp.int32, (blk_b, L, 1), 1)
    keep_prev = (pos > 0).astype(jnp.float32).reshape(M, 1)
    keep_next = (pos < (L - 1)).astype(jnp.float32).reshape(M, 1)

    # Lane-validity mask: LayerNorm moments over the real (unpadded) channels.
    lane = jax.lax.broadcasted_iota(jnp.int32, (1, Cp), 1)
    lane_valid = (lane < c_real).astype(jnp.float32)
    inv_c = 1.0 / c_real

    def conv1d_k3(h, w_ref):
        # h: (M, Cp) f32, unmasked.  out[r] = (m*h)[r-1] @ Wk0 + (m*h)[r] @ Wk1
        #                                   + (m*h)[r+1] @ Wk2, zero padded per sequence.
        hm = h * m
        h_prev = pltpu.roll(hm, shift=1, axis=0) * keep_prev
        h_next = pltpu.roll(hm, shift=M - 1, axis=0) * keep_next
        wd = w_ref.dtype                           # bf16 (perf) or f32 (strict check)
        if use_im2col:
            # Single (M, 3Cp) @ (3Cp, Cp) MXU matmul (3x K occupancy);
            # lane concat at 128-multiples is free vreg grouping.
            h3 = jnp.concatenate(
                [h_prev.astype(wd), hm.astype(wd), h_next.astype(wd)], axis=1)
            return jnp.dot(h3, w_ref[0], preferred_element_type=jnp.float32)
        # VMEM-lean variant (v7x-tight): 3 accumulating dots, no (M, 3Cp) temp.
        w = w_ref[0]
        acc = jnp.dot(h_prev.astype(wd), w[:Cp, :],
                      preferred_element_type=jnp.float32)
        acc = acc + jnp.dot(hm.astype(wd), w[Cp:2 * Cp, :],
                            preferred_element_type=jnp.float32)
        acc = acc + jnp.dot(h_next.astype(wd), w[2 * Cp:, :],
                            preferred_element_type=jnp.float32)
        return acc

    def layernorm(h, gamma, beta):
        # Moments over the c_real valid lanes only (padded lanes are zero).
        mean = jnp.sum(h, axis=-1, keepdims=True) * inv_c
        centered = (h - mean) * lane_valid
        var = jnp.sum(centered * centered, axis=-1, keepdims=True) * inv_c
        scale = jax.lax.rsqrt(var + LN_EPS) * gamma      # padded gamma = 0 -> 0
        shift = beta - mean * scale                      # padded beta = 0 -> 0
        return h * scale + shift                         # strength-reduced epilogue

    residual = x
    h = conv1d_k3(x, w1_ref)
    h = layernorm(h, g1_ref[0], b1_ref[0])
    h = jnp.maximum(h, 0.0)                              # activation (ReLU assumed)
    h = conv1d_k3(h, w2_ref)
    h = layernorm(h, g2_ref[0], b2_ref[0])
    h = jnp.maximum(h + residual, 0.0)
    o_ref[...] = h.reshape(blk_b, L, Cp).astype(o_ref.dtype)


def protein_resnet_nlc(x, mask, stacked_params, *, c_real,
                       block_batch=None, use_im2col=None):
    """Channels-last entry point.  x: (B, L, Cp) lane-padded, mask: (B, L, 1)."""
    W1s, G1s, B1s, W2s, G2s, B2s = stacked_params
    NL = W1s.shape[0]
    B, L, Cp = x.shape
    assert W1s.shape == (NL, 3 * Cp, Cp)
    w_itemsize = W1s.dtype.itemsize

    # Batch block: raise matmul M = Bblk*L toward MXU row count, bounded by a
    # v7x-safe (~40 MiB of 64 MiB physical) VMEM working-set target.
    if block_batch is None:
        bblk = 1
        for cand in range(1, B + 1):
            if B % cand:
                continue
            if cand * L > max(1024, L):
                continue
            if _vmem_estimate(cand, L, Cp, w_itemsize, False) > (40 << 20):
                continue
            bblk = cand
        # v7x has 2 TensorCores: keep >= 2 "parallel" batch steps when M stays large.
        if B // bblk == 1 and B % 2 == 0 and (B // 2) * L >= 256:
            bblk = B // 2
    else:
        bblk = block_batch
    assert B % bblk == 0

    # im2col single-dot conv on v5e/v6e-sized budgets; 3-dot fallback when tight.
    if use_im2col is None:
        use_im2col = _vmem_estimate(bblk, L, Cp, w_itemsize, True) <= (24 << 20)
    vmem_est = _vmem_estimate(bblk, L, Cp, w_itemsize, use_im2col)
    vmem_limit = int(min(96 << 20, max(32 << 20, 2 * vmem_est)))

    act_spec = pl.BlockSpec((bblk, L, Cp), lambda b, l: (b, 0, 0))    # layer-invariant carry
    mask_spec = pl.BlockSpec((bblk, L, 1), lambda b, l: (b, 0, 0))
    w_spec = pl.BlockSpec((1, 3 * Cp, Cp), lambda b, l: (l, 0, 0))
    ln_spec = pl.BlockSpec((1, 1, Cp), lambda b, l: (l, 0, 0))
    # NOTE: weights are the only blocks whose index changes on the inner
    # "arbitrary" axis; pipeline_mode=pl.Buffered(3) on w_spec can hide their
    # DMA if the per-layer body ever becomes too short (default depth is fine
    # at batch-blocked sizes).

    kernel = functools.partial(fused_resnet_kernel,
                               c_real=c_real, use_im2col=use_im2col)
    return pl.pallas_call(
        kernel,
        out_shape=jax.ShapeDtypeStruct((B, L, Cp), x.dtype),
        grid_spec=pltpu.PrefetchScalarGridSpec(
            num_scalar_prefetch=0,
            grid=(B // bblk, NL),
            in_specs=[
                act_spec,    # x (only consumed at layer 0)
                mask_spec,   # padding mask
                w_spec,      # fused conv1 weight (3Cp, Cp)
                ln_spec,     # gamma1
                ln_spec,     # beta1
                w_spec,      # fused conv2 weight
                ln_spec,     # gamma2
                ln_spec,     # beta2
            ],
            out_specs=act_spec,
        ),
        compiler_params=pltpu.CompilerParams(
            dimension_semantics=("parallel", "arbitrary"),
            vmem_limit_bytes=vmem_limit),
    )(x, mask, W1s, G1s, B1s, W2s, G2s, B2s)


def protein_resnet(x_ncl, mask_n1l, stacked_params, *, block_batch=None, use_im2col=None):
    """PyTorch-layout entry point.  x_ncl: (B, C, L), mask_n1l: (B, 1, L)."""
    B, C, L = x_ncl.shape
    Cp = stacked_params[0].shape[-1]
    # These transposes are a full activation HBM round-trip done by XLA; in
    # production keep the model channels-last and use protein_resnet_nlc.
    x = jnp.transpose(x_ncl, (0, 2, 1))                    # (B, L, C)
    if Cp != C:
        x = jnp.pad(x, ((0, 0), (0, 0), (0, Cp - C)))      # lane-pad channels to 128k
    mask = jnp.transpose(mask_n1l, (0, 2, 1))              # (B, L, 1)
    out = protein_resnet_nlc(x, mask, stacked_params, c_real=C,
                             block_batch=block_batch, use_im2col=use_im2col)
    return jnp.transpose(out[..., :C], (0, 2, 1))          # back to (B, C, L)


def stack_torch_params(torch_layer_params, *, compute_dtype=jnp.bfloat16):
    """Stack per-layer PyTorch-convention params into the fused kernel layout.

    Conv weights (Cout, Cin, 3) -> zero-padded, im2col-fused (3*Cp, Cp) in
    `compute_dtype` (bf16 default: MXU-native, half the weight DMA bytes).
    LayerNorm gamma/beta stay f32 and are zero-padded to Cp lanes.
    """
    C = torch_layer_params[0][0].shape[0]
    Cp = _round_up(C, LANE)

    def fuse_conv(W):                                      # (Cout, Cin, K=3)
        Wp = jnp.zeros((Cp, Cp, 3), W.dtype).at[:C, :C, :].set(W)
        w_kic = jnp.transpose(Wp, (2, 1, 0))               # (K, Cin_p, Cout_p)
        return w_kic.reshape(3 * Cp, Cp).astype(compute_dtype)

    def pad_vec(v):
        return jnp.zeros((1, Cp), v.dtype).at[0, :C].set(v)

    W1s, G1s, B1s, W2s, G2s, B2s = [], [], [], [], [], []
    for (W1, g1, b1, W2, g2, b2) in torch_layer_params:
        W1s.append(fuse_conv(W1)); W2s.append(fuse_conv(W2))
        G1s.append(pad_vec(g1));   B1s.append(pad_vec(b1))
        G2s.append(pad_vec(g2));   B2s.append(pad_vec(b2))
    return (jnp.stack(W1s), jnp.stack(G1s), jnp.stack(B1s),
            jnp.stack(W2s), jnp.stack(G2s), jnp.stack(B2s))


# ----------------------- pure-JAX reference (NCL, matches PyTorch) -----------
def _ref_conv1d(x_ncl, w_oik):
    return jax.lax.conv_general_dilated(
        x_ncl, w_oik, window_strides=(1,), padding=((1, 1),),
        dimension_numbers=("NCH", "OIH", "NCH"))


def _ref_layernorm_over_c(x_ncl, gamma_c, beta_c):
    x = jnp.transpose(x_ncl, (0, 2, 1))            # (B, L, C)
    mean = jnp.mean(x, axis=-1, keepdims=True)
    var = jnp.mean(jnp.square(x - mean), axis=-1, keepdims=True)
    y = (x - mean) / jnp.sqrt(var + LN_EPS) * gamma_c + beta_c
    return jnp.transpose(y, (0, 2, 1))


def protein_resnet_ref(x_ncl, mask_n1l, torch_layer_params):
    x = x_ncl
    for (W1, g1, b1, W2, g2, b2) in torch_layer_params:
        residual = x
        h = _ref_conv1d(x * mask_n1l, W1)
        h = _ref_layernorm_over_c(h, g1, b1)
        h = jnp.maximum(h, 0.0)
        h = _ref_conv1d(h * mask_n1l, W2)
        h = _ref_layernorm_over_c(h, g2, b2)
        h = h + residual
        x = jnp.maximum(h, 0.0)
    return x


if __name__ == "__main__":
    B, C, L = 4, 32, 16          # batch, hidden_dim, seq_len (small demo shapes)
    NUM_LAYERS = 2               # args.hidden_layer_num

    key = jax.random.PRNGKey(0)
    key, kx = jax.random.split(key)
    x = jax.random.normal(kx, (B, C, L), dtype=jnp.float32)     # PyTorch NCL input

    # mask: (B, 1, L), 1s for valid positions, 0s for padding
    lengths = jnp.array([L, L - 3, L - 7, 5])
    mask = (jnp.arange(L)[None, None, :] < lengths[:, None, None]).astype(jnp.float32)

    torch_params = []            # PyTorch-convention parameters, per layer
    for _ in range(NUM_LAYERS):
        key, k1, k2, k3, k4, k5, k6 = jax.random.split(key, 7)
        W1 = 0.1 * jax.random.normal(k1, (C, C, 3), dtype=jnp.float32)  # (Cout, Cin, K)
        W2 = 0.1 * jax.random.normal(k2, (C, C, 3), dtype=jnp.float32)
        g1 = 1.0 + 0.05 * jax.random.normal(k3, (C,), dtype=jnp.float32)
        b1 = 0.05 * jax.random.normal(k4, (C,), dtype=jnp.float32)
        g2 = 1.0 + 0.05 * jax.random.normal(k5, (C,), dtype=jnp.float32)
        b2 = 0.05 * jax.random.normal(k6, (C,), dtype=jnp.float32)
        torch_params.append((W1, g1, b1, W2, g2, b2))

    ref = jax.block_until_ready(protein_resnet_ref(x, mask, torch_params))

    # (1) f32-weight path: strict check that the fused/padded/batch-blocked
    #     kernel matches PyTorch semantics exactly.
    out_f32 = protein_resnet(
        x, mask, stack_torch_params(torch_params, compute_dtype=jnp.float32))
    out_f32 = jax.block_until_ready(out_f32)
    assert out_f32.shape == (B, C, L)
    err32 = jnp.max(jnp.abs(out_f32 - ref))
    assert jnp.allclose(out_f32, ref, atol=1e-4, rtol=1e-4), \
        f"f32 path max abs err = {err32}"

    # (2) bf16 MXU-operand path (the performance configuration); f32 carry/LN,
    #     tolerance loosened for bf16 matmul rounding.
    out_bf16 = protein_resnet(
        x, mask, stack_torch_params(torch_params, compute_dtype=jnp.bfloat16))
    out_bf16 = jax.block_until_ready(out_bf16)
    errbf = jnp.max(jnp.abs(out_bf16 - ref))
    assert jnp.allclose(out_bf16, ref, atol=1e-1, rtol=1e-1), \
        f"bf16 path max abs err = {errbf}"

    print("KERNEL_OK")
</pallas_src>

<mosaic_0001>
module attributes {stable_mosaic.version = 11 : i64} {
  func.func @fused_resnet_kernel(%arg0: i32, %arg1: i32, %arg2: memref<4x16x128xf32, #tpu.memory_space<vmem>>, %arg3: memref<4x16x1xf32, #tpu.memory_space<vmem>>, %arg4: memref<1x384x128xf32, #tpu.memory_space<vmem>>, %arg5: memref<1x1x128xf32, #tpu.memory_space<vmem>>, %arg6: memref<1x1x128xf32, #tpu.memory_space<vmem>>, %arg7: memref<1x384x128xf32, #tpu.memory_space<vmem>>, %arg8: memref<1x1x128xf32, #tpu.memory_space<vmem>>, %arg9: memref<1x1x128xf32, #tpu.memory_space<vmem>>, %arg10: memref<4x16x128xf32, #tpu.memory_space<vmem>>) attributes {dimension_semantics = [#tpu.dimension_semantics<parallel>, #tpu.dimension_semantics<arbitrary>], iteration_bounds = array<i64: 1, 2>, scalar_prefetch = 0 : i64, scratch_operands = 0 : i64, tpu.core_type = #tpu.core_type<tc>, window_params = [{transform_indices = @transform_0, window_bounds = array<i64: 4, 16, 128>}, {transform_indices = @transform_1, window_bounds = array<i64: 4, 16, 1>}, {transform_indices = @transform_2, window_bounds = array<i64: 1, 384, 128>}, {transform_indices = @transform_3, window_bounds = array<i64: 1, 1, 128>}, {transform_indices = @transform_4, window_bounds = array<i64: 1, 1, 128>}, {transform_indices = @transform_5, window_bounds = array<i64: 1, 384, 128>}, {transform_indices = @transform_6, window_bounds = array<i64: 1, 1, 128>}, {transform_indices = @transform_7, window_bounds = array<i64: 1, 1, 128>}, {transform_indices = @transform_8, window_bounds = array<i64: 4, 16, 128>}]} {
    %c0_i32 = arith.constant 0 : i32
    %0 = arith.cmpi eq, %arg1, %c0_i32 : i32
    %1 = arith.extui %0 : i1 to i32
    %c0_i32_0 = arith.constant 0 : i32
    %2 = arith.cmpi ne, %1, %c0_i32_0 : i32
    scf.if %2 {
      %c0_43 = arith.constant 0 : index
      %c0_44 = arith.constant 0 : index
      %c0_45 = arith.constant 0 : index
      %112 = vector.load %arg2[%c0_43, %c0_44, %c0_45] : memref<4x16x128xf32, #tpu.memory_space<vmem>>, vector<4x16x128xf32>
      %c0_46 = arith.constant 0 : index
      %c0_47 = arith.constant 0 : index
      %c0_48 = arith.constant 0 : index
      %113 = vector.load %arg10[%c0_46, %c0_47, %c0_48] : memref<4x16x128xf32, #tpu.memory_space<vmem>>, vector<4x16x128xf32>
      tpu.vector_store %arg10[%c0_46, %c0_47, %c0_48], %112 {strides = array<i32>} : memref<4x16x128xf32, #tpu.memory_space<vmem>>, vector<4x16x128xf32>,
    } else {
    }
    %c0 = arith.constant 0 : index
    %c0_1 = arith.constant 0 : index
    %c0_2 = arith.constant 0 : index
    %3 = vector.load %arg10[%c0, %c0_1, %c0_2] : memref<4x16x128xf32, #tpu.memory_space<vmem>>, vector<4x16x128xf32>
    %4 = vector.shape_cast %3 : vector<4x16x128xf32> to vector<64x128xf32>
    %c0_3 = arith.constant 0 : index
    %c0_4 = arith.constant 0 : index
    %c0_5 = arith.constant 0 : index
    %5 = vector.load %arg3[%c0_3, %c0_4, %c0_5] : memref<4x16x1xf32, #tpu.memory_space<vmem>>, vector<4x16x1xf32>
    %6 = vector.shape_cast %5 : vector<4x16x1xf32> to vector<64x1xf32>
    %7 = tpu.iota {dimensions = array<i32: 1>} : vector<4x16x1xi32>
    %c0_i32_6 = arith.constant 0 : i32
    %8 = vector.broadcast %c0_i32_6 : i32 to vector<4x16x1xi32>
    %9 = arith.cmpi sgt, %7, %8 : vector<4x16x1xi32>
    %10 = arith.extui %9 : vector<4x16x1xi1> to vector<4x16x1xi32>
    %11 = arith.sitofp %10 : vector<4x16x1xi32> to vector<4x16x1xf32>
    %12 = vector.shape_cast %11 : vector<4x16x1xf32> to vector<64x1xf32>
    %c15_i32 = arith.constant 15 : i32
    %13 = vector.broadcast %c15_i32 : i32 to vector<4x16x1xi32>
    %14 = arith.cmpi slt, %7, %13 : vector<4x16x1xi32>
    %15 = arith.extui %14 : vector<4x16x1xi1> to vector<4x16x1xi32>
    %16 = arith.sitofp %15 : vector<4x16x1xi32> to vector<4x16x1xf32>
    %17 = vector.shape_cast %16 : vector<4x16x1xf32> to vector<64x1xf32>
    %18 = tpu.iota {dimensions = array<i32: 1>} : vector<1x128xi32>
    %c32_i32 = arith.constant 32 : i32
    %19 = vector.broadcast %c32_i32 : i32 to vector<1x128xi32>
    %20 = arith.cmpi slt, %18, %19 : vector<1x128xi32>
    %21 = arith.extui %20 : vector<1x128xi1> to vector<1x128xi32>
    %22 = arith.sitofp %21 : vector<1x128xi32> to vector<1x128xf32>
    %23 = vector.broadcast %6 : vector<64x1xf32> to vector<64x128xf32>
    %24 = arith.mulf %4, %23 : vector<64x128xf32>
    %c1_i32 = arith.constant 1 : i32
    %25 = tpu.dynamic_rotate %24 by %c1_i32 dim 0 : vector<64x128xf32>, i32 -> vector<64x128xf32>
    %26 = vector.broadcast %12 : vector<64x1xf32> to vector<64x128xf32>
    %27 = arith.mulf %25, %26 : vector<64x128xf32>
    %c63_i32 = arith.constant 63 : i32
    %28 = tpu.dynamic_rotate %24 by %c63_i32 dim 0 : vector<64x128xf32>, i32 -> vector<64x128xf32>
    %29 = vector.broadcast %17 : vector<64x1xf32> to vector<64x128xf32>
    %30 = arith.mulf %28, %29 : vector<64x128xf32>
    %31 = tpu.concatenate %27, %24, %30 in 1 : vector<64x128xf32>, vector<64x128xf32>, vector<64x128xf32> -> vector<64x384xf32>
    %c0_7 = arith.constant 0 : index
    %c0_8 = arith.constant 0 : index
    %c0_9 = arith.constant 0 : index
    %32 = vector.load %arg4[%c0_7, %c0_8, %c0_9] : memref<1x384x128xf32, #tpu.memory_space<vmem>>, vector<1x384x128xf32>
    %33 = vector.shape_cast %32 : vector<1x384x128xf32> to vector<384x128xf32>
    %cst = arith.constant dense<0.000000e+00> : vector<64x128xf32>
    %34 = tpu.matmul %31, %33, %cst {dimension_numbers = #tpu.dot_dimension_numbers<[1], [0], [0], [1], [0, 0, 1, 1], [], []>} : vector<64x384xf32>, vector<384x128xf32>, vector<64x128xf32> -> vector<64x128xf32>
    %c0_10 = arith.constant 0 : index
    %c0_11 = arith.constant 0 : index
    %c0_12 = arith.constant 0 : index
    %35 = vector.load %arg5[%c0_10, %c0_11, %c0_12] : memref<1x1x128xf32, #tpu.memory_space<vmem>>, vector<1x1x128xf32>
    %36 = vector.shape_cast %35 : vector<1x1x128xf32> to vector<1x128xf32>
    %c0_13 = arith.constant 0 : index
    %c0_14 = arith.constant 0 : index
    %c0_15 = arith.constant 0 : index
    %37 = vector.load %arg6[%c0_13, %c0_14, %c0_15] : memref<1x1x128xf32, #tpu.memory_space<vmem>>, vector<1x1x128xf32>
    %38 = vector.shape_cast %37 : vector<1x1x128xf32> to vector<1x128xf32>
    %cst_16 = arith.constant dense<0.000000e+00> : vector<64xf32>
    %39 = vector.multi_reduction <add>, %34, %cst_16 [1] : vector<64x128xf32> to vector<64xf32>
    %40 = vector.shape_cast %39 : vector<64xf32> to vector<64x1xf32>
    %cst_17 = arith.constant 3.125000e-02 : f32
    %41 = vector.broadcast %cst_17 : f32 to vector<64x1xf32>
    %42 = arith.mulf %40, %41 : vector<64x1xf32>
    %43 = vector.broadcast %42 : vector<64x1xf32> to vector<64x128xf32>
    %44 = arith.subf %34, %43 : vector<64x128xf32>
    %45 = vector.broadcast %22 : vector<1x128xf32> to vector<64x128xf32>
    %46 = arith.mulf %44, %45 : vector<64x128xf32>
    %47 = arith.mulf %46, %46 : vector<64x128xf32>
    %cst_18 = arith.constant dense<0.000000e+00> : vector<64xf32>
    %48 = vector.multi_reduction <add>, %47, %cst_18 [1] : vector<64x128xf32> to vector<64xf32>
    %49 = vector.shape_cast %48 : vector<64xf32> to vector<64x1xf32>
    %cst_19 = arith.constant 3.125000e-02 : f32
    %50 = vector.broadcast %cst_19 : f32 to vector<64x1xf32>
    %51 = arith.mulf %49, %50 : vector<64x1xf32>
    %cst_20 = arith.constant 9.99999974E-6 : f32
    %52 = vector.broadcast %cst_20 : f32 to vector<64x1xf32>
    %53 = arith.addf %51, %52 : vector<64x1xf32>
    %54 = math.rsqrt %53 : vector<64x1xf32>
    %55 = vector.broadcast %54 : vector<64x1xf32> to vector<64x128xf32>
    %56 = vector.broadcast %36 : vector<1x128xf32> to vector<64x128xf32>
    %57 = arith.mulf %55, %56 : vector<64x128xf32>
    %58 = vector.broadcast %42 : vector<64x1xf32> to vector<64x128xf32>
    %59 = arith.mulf %58, %57 : vector<64x128xf32>
    %60 = vector.broadcast %38 : vector<1x128xf32> to vector<64x128xf32>
    %61 = arith.subf %60, %59 : vector<64x128xf32>
    %62 = arith.mulf %34, %57 : vector<64x128xf32>
    %63 = arith.addf %62, %61 : vector<64x128xf32>
    %cst_21 = arith.constant 0.000000e+00 : f32
    %64 = vector.broadcast %cst_21 : f32 to vector<64x128xf32>
    %65 = arith.maximumf %63, %64 : vector<64x128xf32>
    %66 = vector.broadcast %6 : vector<64x1xf32> to vector<64x128xf32>
    %67 = arith.mulf %65, %66 : vector<64x128xf32>
    %c1_i32_22 = arith.constant 1 : i32
    %68 = tpu.dynamic_rotate %67 by %c1_i32_22 dim 0 : vector<64x128xf32>, i32 -> vector<64x128xf32>
    %69 = vector.broadcast %12 : vector<64x1xf32> to vector<64x128xf32>
    %70 = arith.mulf %68, %69 : vector<64x128xf32>
    %c63_i32_23 = arith.constant 63 : i32
    %71 = tpu.dynamic_rotate %67 by %c63_i32_23 dim 0 : vector<64x128xf32>, i32 -> vector<64x128xf32>
    %72 = vector.broadcast %17 : vector<64x1xf32> to vector<64x128xf32>
    %73 = arith.mulf %71, %72 : vector<64x128xf32>
    %74 = tpu.concatenate %70, %67, %73 in 1 : vector<64x128xf32>, vector<64x128xf32>, vector<64x128xf32> -> vector<64x384xf32>
    %c0_24 = arith.constant 0 : index
    %c0_25 = arith.constant 0 : index
    %c0_26 = arith.constant 0 : index
    %75 = vector.load %arg7[%c0_24, %c0_25, %c0_26] : memref<1x384x128xf32, #tpu.memory_space<vmem>>, vector<1x384x128xf32>
    %76 = vector.shape_cast %75 : vector<1x384x128xf32> to vector<384x128xf32>
    %cst_27 = arith.constant dense<0.000000e+00> : vector<64x128xf32>
    %77 = tpu.matmul %74, %76, %cst_27 {dimension_numbers = #tpu.dot_dimension_numbers<[1], [0], [0], [1], [0, 0, 1, 1], [], []>} : vector<64x384xf32>, vector<384x128xf32>, vector<64x128xf32> -> vector<64x128xf32>
    %c0_28 = arith.constant 0 : index
    %c0_29 = arith.constant 0 : index
    %c0_30 = arith.constant 0 : index
    %78 = vector.load %arg8[%c0_28, %c0_29, %c0_30] : memref<1x1x128xf32, #tpu.memory_space<vmem>>, vector<1x1x128xf32>
    %79 = vector.shape_cast %78 : vector<1x1x128xf32> to vector<1x128xf32>
    %c0_31 = arith.constant 0 : index
    %c0_32 = arith.constant 0 : index
    %c0_33 = arith.constant 0 : index
    %80 = vector.load %arg9[%c0_31, %c0_32, %c0_33] : memref<1x1x128xf32, #tpu.memory_space<vmem>>, vector<1x1x128xf32>
    %81 = vector.shape_cast %80 : vector<1x1x128xf32> to vector<1x128xf32>
    %cst_34 = arith.constant dense<0.000000e+00> : vector<64xf32>
    %82 = vector.multi_reduction <add>, %77, %cst_34 [1] : vector<64x128xf32> to vector<64xf32>
    %83 = vector.shape_cast %82 : vector<64xf32> to vector<64x1xf32>
    %cst_35 = arith.constant 3.125000e-02 : f32
    %84 = vector.broadcast %cst_35 : f32 to vector<64x1xf32>
    %85 = arith.mulf %83, %84 : vector<64x1xf32>
    %86 = vector.broadcast %85 : vector<64x1xf32> to vector<64x128xf32>
    %87 = arith.subf %77, %86 : vector<64x128xf32>
    %88 = vector.broadcast %22 : vector<1x128xf32> to vector<64x128xf32>
    %89 = arith.mulf %87, %88 : vector<64x128xf32>
    %90 = arith.mulf %89, %89 : vector<64x128xf32>
    %cst_36 = arith.constant dense<0.000000e+00> : vector<64xf32>
    %91 = vector.multi_reduction <add>, %90, %cst_36 [1] : vector<64x128xf32> to vector<64xf32>
    %92 = vector.shape_cast %91 : vector<64xf32> to vector<64x1xf32>
    %cst_37 = arith.constant 3.125000e-02 : f32
    %93 = vector.broadcast %cst_37 : f32 to vector<64x1xf32>
    %94 = arith.mulf %92, %93 : vector<64x1xf32>
    %cst_38 = arith.constant 9.99999974E-6 : f32
    %95 = vector.broadcast %cst_38 : f32 to vector<64x1xf32>
    %96 = arith.addf %94, %95 : vector<64x1xf32>
    %97 = math.rsqrt %96 : vector<64x1xf32>
    %98 = vector.broadcast %97 : vector<64x1xf32> to vector<64x128xf32>
    %99 = vector.broadcast %79 : vector<1x128xf32> to vector<64x128xf32>
    %100 = arith.mulf %98, %99 : vector<64x128xf32>
    %101 = vector.broadcast %85 : vector<64x1xf32> to vector<64x128xf32>
    %102 = arith.mulf %101, %100 : vector<64x128xf32>
    %103 = vector.broadcast %81 : vector<1x128xf32> to vector<64x128xf32>
    %104 = arith.subf %103, %102 : vector<64x128xf32>
    %105 = arith.mulf %77, %100 : vector<64x128xf32>
    %106 = arith.addf %105, %104 : vector<64x128xf32>
    %107 = arith.addf %106, %4 : vector<64x128xf32>
    %cst_39 = arith.constant 0.000000e+00 : f32
    %108 = vector.broadcast %cst_39 : f32 to vector<64x128xf32>
    %109 = arith.maximumf %107, %108 : vector<64x128xf32>
    %110 = vector.shape_cast %109 : vector<64x128xf32> to vector<4x16x128xf32>
    %c0_40 = arith.constant 0 : index
    %c0_41 = arith.constant 0 : index
    %c0_42 = arith.constant 0 : index
    %111 = vector.load %arg10[%c0_40, %c0_41, %c0_42] : memref<4x16x128xf32, #tpu.memory_space<vmem>>, vector<4x16x128xf32>
    tpu.vector_store %arg10[%c0_40, %c0_41, %c0_42], %110 {strides = array<i32>} : memref<4x16x128xf32, #tpu.memory_space<vmem>>, vector<4x16x128xf32>,
    return
  }
  func.func @transform_0(%arg0: i32, %arg1: i32) -> (i32, i32, i32) {
    %c0_i32 = arith.constant 0 : i32
    %c0_i32_0 = arith.constant 0 : i32
    %c0_i32_1 = arith.constant 0 : i32
    return %arg0, %c0_i32, %c0_i32_0 : i32, i32, i32
  }
  func.func @transform_1(%arg0: i32, %arg1: i32) -> (i32, i32, i32) {
    %c0_i32 = arith.constant 0 : i32
    %c0_i32_0 = arith.constant 0 : i32
    %c0_i32_1 = arith.constant 0 : i32
    return %arg0, %c0_i32, %c0_i32_0 : i32, i32, i32
  }
  func.func @transform_2(%arg0: i32, %arg1: i32) -> (i32, i32, i32) {
    %c0_i32 = arith.constant 0 : i32
    %c0_i32_0 = arith.constant 0 : i32
    %c0_i32_1 = arith.constant 0 : i32
    return %arg1, %c0_i32, %c0_i32_0 : i32, i32, i32
  }
  func.func @transform_3(%arg0: i32, %arg1: i32) -> (i32, i32, i32) {
    %c0_i32 = arith.constant 0 : i32
    %c0_i32_0 = arith.constant 0 : i32
    %c0_i32_1 = arith.constant 0 : i32
    return %arg1, %c0_i32, %c0_i32_0 : i32, i32, i32
  }
  func.func @transform_4(%arg0: i32, %arg1: i32) -> (i32, i32, i32) {
    %c0_i32 = arith.constant 0 : i32
    %c0_i32_0 = arith.constant 0 : i32
    %c0_i32_1 = arith.constant 0 : i32
    return %arg1, %c0_i32, %c0_i32_0 : i32, i32, i32
  }
  func.func @transform_5(%arg0: i32, %arg1: i32) -> (i32, i32, i32) {
    %c0_i32 = arith.constant 0 : i32
    %c0_i32_0 = arith.constant 0 : i32
    %c0_i32_1 = arith.constant 0 : i32
    return %arg1, %c0_i32, %c0_i32_0 : i32, i32, i32
  }
  func.func @transform_6(%arg0: i32, %arg1: i32) -> (i32, i32, i32) {
    %c0_i32 = arith.constant 0 : i32
    %c0_i32_0 = arith.constant 0 : i32
    %c0_i32_1 = arith.constant 0 : i32
    return %arg1, %c0_i32, %c0_i32_0 : i32, i32, i32
  }
  func.func @transform_7(%arg0: i32, %arg1: i32) -> (i32, i32, i32) {
    %c0_i32 = arith.constant 0 : i32
    %c0_i32_0 = arith.constant 0 : i32
    %c0_i32_1 = arith.constant 0 : i32
    return %arg1, %c0_i32, %c0_i32_0 : i32, i32, i32
  }
  func.func @transform_8(%arg0: i32, %arg1: i32) -> (i32, i32, i32) {
    %c0_i32 = arith.constant 0 : i32
    %c0_i32_0 = arith.constant 0 : i32
    %c0_i32_1 = arith.constant 0 : i32
    return %arg0, %c0_i32, %c0_i32_0 : i32, i32, i32
  }
}

</mosaic_0001>

<bundles_post_ra>
// kernel: tpu_custom_call.1
= control target key start
LH: loop header
LB: loop body
LE: loop exit
PB: predicated region body
PF: predicated region fallthrough
CT: control target
= control target key end

     0   :  { %s3157_s0 = inlined_call_operand.vmem [shape: f32[4,16,128], index: 0, kind: input, shape index: {}]   ;;  %s3158_s1 = inlined_call_operand.vmem [shape: f32[4,16,1], index: 1, kind: input, shape index: {}]   ;;  %s3159_s2 = inlined_call_operand.hbm [shape: f32[2,384,128], index: 2, kind: input, shape index: {}]   ;;  %s3160_s3 = inlined_call_operand.vmem [shape: f32[2,1,128], index: 3, kind: input, shape index: {}]   ;;  %s3161_s4 = inlined_call_operand.vmem [shape: f32[2,1,128], index: 4, kind: input, shape index: {}]   ;;  %s3162_s5 = inlined_call_operand.hbm [shape: f32[2,384,128], index: 5, kind: input, shape index: {}]   ;;  %s3163_s6 = inlined_call_operand.vmem [shape: f32[2,1,128], index: 6, kind: input, shape index: {}]   ;;  %s3164_s7 = inlined_call_operand.vmem [shape: f32[2,1,128], index: 7, kind: input, shape index: {}]   ;;  %s3165_s8 = inlined_call_operand.hbm [shape: f32[4,16,128], index: 8, kind: output, shape index: {}]  }
   0x1   :  { %3169 = sst [smem:[#allocation11_spill]] %s3159_s2 }
   0x2   :  { %13 = vsyncpa [#allocation3], 0 }
   0x3   :  { %15 = vsyncpa [#allocation3 + $0x1], 0 }
   0x4   :  { %16 = vsyncpa [#allocation6], 0 }
   0x5   :  { %18 = vsyncpa [#allocation6 + $0x1], 0 }
   0x6   :  { %19 = vsyncpa [#allocation4], 0  ;;  %s2397_s27 = smov 0   ;;  %s2399_s28 = smov 0  }
   0x7   :  { %s2401_s29 = smov 0   ;;  %s2403_s30 = smov 0  }
   0x8   :  { %s2405_s9 = smov 0   ;;  %s2407_s10 = smov 0  }
   0x9 LB: > { %s3166_s11 = sadd.s32 4294967295, %s2341_s10   ;;  %s34_s12 = sadd.s32 1, %s2337_s9  ;;  %s2341_s10 = sphi %s2407_s10, %s25_s10   ;;  %s2337_s9 = sphi %s2405_s9, %s3183_s9   ;;  %s2333_s30 = sphi %s2403_s30, %s3182_s30   ;;  %s2329_s29 = sphi %s2401_s29, %s3181_s29   ;;  %s2325_s28 = sphi %s2399_s28, %s3180_s28   ;;  %s2321_s27 = sphi %s2397_s27, %s3179_s27  }
   0xa   : > { %p35_p0 = scmp.ge.s32.totalorder %s34_s12, 2  ;;  %s96_s13 = sadd.s32 1, %s2329_s29 }
   0xb   : > { %p103_p1 = scmp.ne.s32.totalorder %s2329_s29, %s2325_s28  ;;  %p104_p2 = scmp.eq.s32.totalorder %s2341_s10, 0 }
   0xc   : > { %s3185_s12 = smov (%p35_p0, %s34_s12), 0  ;;  %p109_p4 = scmp.ne.s32.totalorder %s2325_s28, %s2321_s27 }
   0xd   : > { %p105_p3 = por %p104_p2, %p103_p1  ;;  %s93_s14 = ssub.s32 %s2337_s9, %s3185_s12 }
   0xe   : > { %p110_p5 = scmp.eq.s32.totalorder %s3166_s11, 0  ;;  %p94_p6 = scmp.eq.s32.totalorder %s93_s14, 0 }
   0xf   : > { %p2097_p8 = scmp.lt.s32.totalorder %s2341_s10, 2  ;;  %s2447_s17 = sand.u32 1, %s2329_s29  }
  0x10   : > { %p2438_p7 = por %p110_p5, %p109_p4  ;;  %s2078_s18 = smul.u32 6144, %s2337_s9 }
  0x11   : > { %s2444_s16 = scalar_select %p94_p6, %s2329_s29, %s96_s13  }
  0x12   : > { %s3170_s15 = scalar_select %p2438_p7, 1, 0 }
  0x13   : > { %s2077_s19 = smul.u32 384, %s2447_s17  ;;  %s3171_s2 = sld [smem:[#allocation11_spill]] }
  0x14   : > { %p2458_p9 = pnand %p2097_p8, %p105_p3  ;;  %s310_s26 = scalar_lea.sflag [#allocation3], %s2447_s17 }
  0x15   : > { %s313_s24 = scalar_lea.vmem [#allocation2], %s2077_s19 }
  0x16   : > { %s320_s25 = sshll.u32 %s313_s24, 4  ;;  %p2199_p11 = pneg %p2458_p9  ;;  %s2464_s25 = int_to_ptr.vmem [resolvable:$true] %s320_s25 }
  0x19   : > { %s2456_s22 = scalar_lea.hbm %s3171_s2, %s2078_s18  ;;  %s2202_s20 = scalar_lea.hbm %s3171_s2, 12288 }
  0x1a   : > { %s2197_s27 = scalar_lea.hbm %s2456_s22, 6144  ;;  %p2203_p0 = scmp.lt.u32.totalorder %s2456_s22, %s3171_s2 }
  0x1b   : > { %p2198_p10 = scmp.ne.s32.totalorder %s2456_s22, %s2197_s27  ;;  %p2204_p1 = scmp.lt.u32.totalorder %s2202_s20, %s2197_s27 }
  0x1c   : > { %p2206_p3 = scmp.lt.u32.totalorder %s2197_s27, %s2456_s22 }
  0x1d   : > { %p2200_p12 = pnand %p2199_p11, %p2198_p10  ;;  %p2205_p2 = por %p2204_p1, %p2203_p0 }
  0x1f   : > { %p2201_p13 = pneg %p2200_p12  ;;  %p2207_p4 = por %p2206_p3, %p2205_p2 }
  0x21   : > { %p2208_p5 = pnand %p2207_p4, %p2201_p13 }
  0x23   : > { %2211 = shalt.err (!%p2208_p5)
}
  0x24   : > { %s2212_s24 = scalar_lea.vmem %s2464_s25, 6144  ;;  %s2343_s13 = smov [#allocation2]  }
  0x25   : > { %p2213_p6 = scmp.ne.s32.totalorder %s2464_s25, %s2212_s24  ;;  %s2217_s14 = sshll.u32 %s2343_s13, 4  ;;  %s2218_s14 = int_to_ptr.vmem [resolvable:$false] %s2217_s14 }
  0x26   : > { %s2219_s11 = scalar_lea.vmem %s2218_s14, 12288  ;;  %p2220_p12 = scmp.lt.s32.totalorder %s2464_s25, %s2218_s14 }
  0x27   : > { %p2215_p8 = pnand %p2213_p6, %p2199_p11  ;;  %p2221_p0 = scmp.lt.s32.totalorder %s2219_s11, %s2212_s24 }
  0x29   : > { %p2216_p10 = pneg %p2215_p8  ;;  %p2222_p1 = por %p2221_p0, %p2220_p12 }
  0x2b   : > { %p2223_p2 = pnand %p2222_p1, %p2216_p10 }
  0x2d   : > { %2226 = shalt.err (!%p2223_p2)
}
  0x2e   : > { %s3167_s27 = smov 128   ;;  %s2345_s20 = smov 8  }
  0x2f   : > { %2093 = dma.hbm_to_vmem [thread:$0]  (!%p2458_p9), %s2456_s22, 6144, %s2464_s25, %s310_s26, %s3167_s27, %s3167_s27, %s2345_s20  }
  0x30   : > { %p1688_p13 = scmp.ge.s32.totalorder %s2341_s10, 1  ;;  %p373_p3 = scmp.lt.s32.totalorder %s2341_s10, 3 }
  0x31   : > { %s2508_s14 = scalar_lea.hbm %s3162_s5, %s2078_s18  ;;  %s346_s11 = scalar_lea.vmem [#allocation5], %s2077_s19 }
  0x32   : > { %p2499_p4 = pnand %p1688_p13, %p373_p3  ;;  %s353_s2 = sshll.u32 %s346_s11, 4  ;;  %s2512_s2 = int_to_ptr.vmem [resolvable:$true] %s353_s2 }
  0x33   : > { %s343_s22 = scalar_lea.sflag [#allocation6], %s2447_s17  ;;  %s2227_s25 = scalar_lea.hbm %s2508_s14, 6144 }
  0x34   : > { %p2228_p5 = scmp.ne.s32.totalorder %s2508_s14, %s2227_s25  ;;  %s2232_s18 = scalar_lea.hbm %s3162_s5, 12288 }
  0x35   : > { %p2233_p10 = scmp.lt.u32.totalorder %s2508_s14, %s3162_s5  ;;  %p2234_p12 = scmp.lt.u32.totalorder %s2232_s18, %s2227_s25 }
  0x36   : > { %p2230_p6 = pnand %p2228_p5, %p2199_p11  ;;  %p2236_p1 = scmp.lt.u32.totalorder %s2227_s25, %s2508_s14 }
  0x37   : > { %p2235_p0 = por %p2234_p12, %p2233_p10 }
  0x38   : > { %p2231_p8 = pneg %p2230_p6 }
  0x39   : > { %p2237_p2 = por %p2236_p1, %p2235_p0 }
  0x3b   : > { %p2238_p13 = pnand %p2237_p2, %p2231_p8 }
  0x3d   : > { %2241 = shalt.err (!%p2238_p13)
}
  0x3e   : > { %s2242_s19 = scalar_lea.vmem %s2512_s2, 6144  ;;  %s2346_s11 = smov [#allocation5]  }
  0x3f   : > { %p2243_p3 = scmp.ne.s32.totalorder %s2512_s2, %s2242_s19  ;;  %s2247_s26 = sshll.u32 %s2346_s11, 4  ;;  %s2248_s26 = int_to_ptr.vmem [resolvable:$false] %s2247_s26 }
  0x40   : > { %s2249_s27 = scalar_lea.vmem %s2248_s26, 12288  ;;  %p2250_p7 = scmp.lt.s32.totalorder %s2512_s2, %s2248_s26 }
  0x41   : > { %p2245_p5 = pnand %p2243_p3, %p2199_p11  ;;  %p2251_p10 = scmp.lt.s32.totalorder %s2249_s27, %s2242_s19 }
  0x43   : > { %p2246_p6 = pneg %p2245_p5  ;;  %p2252_p12 = por %p2251_p10, %p2250_p7 }
  0x45   : > { %p2253_p0 = pnand %p2252_p12, %p2246_p6 }
  0x47   : > { %2256 = shalt.err (!%p2253_p0)
}
  0x48   : > { %s3174_s25 = smov 128   ;;  %377 = sbr.rel (%p2499_p4) target bundleno = 1382 (0x566), region = 52 }
  0x49   : > { %2096 = dma.hbm_to_vmem [thread:$0]  (!%p2458_p9), %s2508_s14, 6144, %s2512_s2, %s343_s22, %s3174_s25, %s3174_s25, %s2345_s20  }
  0x4a   : > { %s379_s24 = sand.u32 (!%p2499_p4), 1, %s2325_s28   ;;  %p3175_p7 = scmp.ne.s32.totalorder (!%p2499_p4), %s3170_s15, 0 }
  0x4b   : > { %s2081_s18 = smul.u32 (!%p2499_p4), 384, %s379_s24  ;;  %s380_s13 = scalar_lea.sflag (!%p2499_p4), [#allocation3], %s379_s24 }
  0x4d   : > { %s2546_s19 = scalar_lea.vmem (!%p2499_p4), [#allocation2], %s2081_s18 }
  0x4f   : > { %2308 = dma.done.wait (%p3175_p7), %s380_s13, 6144  }
  0x50   : > { %2310 = vsyncadd (%p3175_p7), %s380_s13, 4294961152  ;;  %s389_s17 = scalar_lea.sflag [#allocation6], %s379_s24  ;;  %s2552_s23 = scalar_lea.vmem [#allocation5], %s2081_s18 }
  0x51   : > { %2312 = dma.done.wait (%p3175_p7), %s389_s17, 6144  }
  0x52   : > { %2314 = vsyncadd (%p3175_p7), %s389_s17, 4294961152  ;;  %p463_p9 = scmp.lt.s32.totalorder %s2333_s30, 1  ;;  %p1689_p11 = scmp.ne.s32.totalorder %s2333_s30, 0 }
  0x53   : > { %v480_v0 = vld [vmem:[%s3157_s0] sm:$0xff] (!%p1689_p11)  ;;  %v481_v1 = vld [vmem:[%s3157_s0 + $0x8] sm:$0xff] (!%p1689_p11)  ;;  %v482_v2 = vld [vmem:[%s3157_s0 + $0x10] sm:$0xff] (!%p1689_p11) }
  0x54   : > { %s2560_s2 = scalar_select %p463_p9, %s2333_s30, 1 }
  0x55   : > { %479 = sbr.rel (%p1689_p11) target bundleno = 92 (0x5c), region = 64  ;;  %488 = vst [vmem:[#allocation7] sm:$0xff] (!%p1689_p11), %v480_v0  ;;  %489 = vst [vmem:[#allocation7 + $0x8] sm:$0xff] (!%p1689_p11), %v481_v1  ;;  %v483_v3 = vld [vmem:[%s3157_s0 + $0x18] sm:$0xff] (!%p1689_p11)  ;;  %v484_v4 = vld [vmem:[%s3157_s0 + $0x20] sm:$0xff] (!%p1689_p11) }
  0x56   : > { %s468_s26 = scalar_lea.vmem %s3161_s4, %s2560_s2  ;;  %s471_s25 = scalar_lea.vmem %s3163_s6, %s2560_s2  ;;  %490 = vst [vmem:[#allocation7 + $0x10] sm:$0xff] (!%p1689_p11), %v482_v2  ;;  %v485_v5 = vld [vmem:[%s3157_s0 + $0x28] sm:$0xff] (!%p1689_p11)  ;;  %491 = vst [vmem:[#allocation7 + $0x18] sm:$0xff] (!%p1689_p11), %v483_v3  ;;  %v486_v6 = vld [vmem:[%s3157_s0 + $0x30] sm:$0xff] (!%p1689_p11) }
  0x57   : > { %s474_s13 = scalar_lea.vmem %s3164_s7, %s2560_s2  ;;  %492 = vst [vmem:[#allocation7 + $0x20] sm:$0xff] (!%p1689_p11), %v484_v4  ;;  %493 = vst [vmem:[#allocation7 + $0x28] sm:$0xff] (!%p1689_p11), %v485_v5  ;;  %v487_v7 = vld [vmem:[%s3157_s0 + $0x38] sm:$0xff] (!%p1689_p11) }
  0x58   : > { %494 = vst [vmem:[#allocation7 + $0x30] sm:$0xff] (!%p1689_p11), %v486_v6  ;;  %495 = vst [vmem:[#allocation7 + $0x38] sm:$0xff] (!%p1689_p11), %v487_v7 }
  0x5c PF: > { %v505_v8 = vld [vmem:[%s3158_s1 + $0x8] sm:$0xff]  ;;  %v504_v9 = vld [vmem:[%s3158_s1] sm:$0xff]  ;;  %v2347_v10 = vmov 0   ;;  %v506_v11 = vld [vmem:[%s3158_s1 + $0x10] sm:$0xff]  ;;  %v512_v56 = vlaneseq  ;;  %v2348_v3 = vmov 0.0   ;;  %s3176_s17 = scalar_lea.vmem %s3160_s3, %s2560_s2  ;;  %s2349_s2 = smov [#allocation7]  }
  0x5d   : > { %2156 = vset.pattern.permute.xlu1 %v2347_v10  ;;  %2155 = vset.pattern.permute.xlu0 %v2347_v10  ;;  %v511_v12 = vld [vmem:[%s3158_s1 + $0x38] sm:$0xff]  ;;  %v646_v13 = vld [vmem:[%s2546_s19 + $0x80] sm:$0xff]  ;;  %v647_v14 = vld [vmem:[%s2546_s19 + $0x88] sm:$0xff] }
  0x5e   : > { %539 = vperm.xlu1 %2156, %v505_v8   ;;  %534 = vperm.xlu0 %2155, %v504_v9   ;;  %v662_v15 = vld [vmem:[%s2546_s19 + $0x100] sm:$0xff]  ;;  %v663_v16 = vld [vmem:[%s2546_s19 + $0x108] sm:$0xff]  ;;  %v1949_v17 = vpack.c.bf16 %v647_v14, %v646_v13  ;;  %v648_v21 = vld [vmem:[%s2546_s19 + $0x90] sm:$0xff]  ;;  %v528_v58 = vand.u32 127, %v512_v56 }
  0x5f   : > { %v1981_v18 = vpack.c.bf16 %v663_v16, %v662_v15  ;;  %v630_v19 = vld [vmem:[%s2546_s19] sm:$0xff]  ;;  %v631_v20 = vld [vmem:[%s2546_s19 + $0x8] sm:$0xff]  ;;  %v507_v23 = vld [vmem:[%s3158_s1 + $0x18] sm:$0xff] }
  0x60   : > { %v508_v22 = vld [vmem:[%s3158_s1 + $0x20] sm:$0xff]  ;;  %v1951_v24 = vpack.c.bf16 %v631_v20, %v630_v19  ;;  %v649_v25 = vld [vmem:[%s2546_s19 + $0x98] sm:$0xff]  ;;  %v664_v26 = vld [vmem:[%s2546_s19 + $0x110] sm:$0xff]  ;;  %1950 = vmatprep.subr.bf16.mxu0 %v1949_v17  ;;  %vm529_vm0 = vcmp.lt.s32.totalorder %v528_v58, 32 }
  0x61   : > { %v665_v27 = vld [vmem:[%s2546_s19 + $0x118] sm:$0xff]  ;;  %v1953_v28 = vpack.c.bf16 %v649_v25, %v648_v21  ;;  %v632_v30 = vld [vmem:[%s2546_s19 + $0x10] sm:$0xff]  ;;  %v650_v32 = vld [vmem:[%s2546_s19 + $0xa0] sm:$0xff]  ;;  %1982 = vmatprep.subr.bf16.mxu1 %v1981_v18  ;;  %v2662_v4 = vsel %vm529_vm0, 1.0, %v2348_v3 }
  0x62   : > { %544 = vperm.xlu1 %2156, %v506_v11   ;;  %569 = vperm.xlu0 %2155, %v511_v12   ;;  %v1985_v29 = vpack.c.bf16 %v665_v27, %v664_v26  ;;  %v633_v31 = vld [vmem:[%s2546_s19 + $0x18] sm:$0xff]  ;;  %v651_v33 = vld [vmem:[%s2546_s19 + $0xa8] sm:$0xff]  ;;  %v666_v34 = vld [vmem:[%s2546_s19 + $0x120] sm:$0xff] }
  0x63   : > { %v667_v35 = vld [vmem:[%s2546_s19 + $0x128] sm:$0xff]  ;;  %1952 = vmatpush3.bf16.msra.mxu0 %v1951_v24  ;;  %1984 = vmatpush3.bf16.msra.mxu1 %v1981_v18  ;;  %v1955_v36 = vpack.c.bf16 %v633_v31, %v632_v30  ;;  %v1957_v37 = vpack.c.bf16 %v651_v33, %v650_v32  ;;  %v634_v39 = vld [vmem:[%s2546_s19 + $0x20] sm:$0xff]  ;;  %v652_v41 = vld [vmem:[%s2546_s19 + $0xb0] sm:$0xff]  ;;  %v2678_v31 = vshrl.u32 %v512_v56, 7 }
  0x64   : > { %1954 = vmatprep.subr.bf16.mxu0 %v1953_v28  ;;  %1986 = vmatprep.subr.bf16.mxu1 %v1985_v29  ;;  %v1989_v38 = vpack.c.bf16 %v667_v35, %v666_v34  ;;  %v635_v40 = vld [vmem:[%s2546_s19 + $0x28] sm:$0xff]  ;;  %v653_v42 = vld [vmem:[%s2546_s19 + $0xb8] sm:$0xff]  ;;  %v668_v43 = vld [vmem:[%s2546_s19 + $0x130] sm:$0xff] }
  0x65   : > { %v669_v44 = vld [vmem:[%s2546_s19 + $0x138] sm:$0xff]  ;;  %v510_v45 = vld [vmem:[%s3158_s1 + $0x30] sm:$0xff]  ;;  %v509_v46 = vld [vmem:[%s3158_s1 + $0x28] sm:$0xff]  ;;  %v1959_v47 = vpack.c.bf16 %v635_v40, %v634_v39  ;;  %v1961_v48 = vpack.c.bf16 %v653_v42, %v652_v41  ;;  %v514_v34 = vadd.s32 8, %v2678_v31  ;;  %vm613_vm1 = vcmp.lt.s32.totalorder %v2678_v31, 7 }
  0x66   : > { %554 = vperm.xlu1 %2156, %v508_v22   ;;  %549 = vperm.xlu0 %2155, %v507_v23   ;;  %v1993_v49 = vpack.c.bf16 %v669_v44, %v668_v43  ;;  %v636_v50 = vld [vmem:[%s2546_s19 + $0x30] sm:$0xff]  ;;  %v637_v51 = vld [vmem:[%s2546_s19 + $0x38] sm:$0xff]  ;;  %v654_v52 = vld [vmem:[%s2546_s19 + $0xc0] sm:$0xff]  ;;  %vm515_vm2 = vcmp.gt.s32.totalorder %v2678_v31, 0  ;;  %vm588_vm4 = vcmp.lt.s32.totalorder %v2678_v31, 1 }
  0x67   : > { %1956 = vmatpush3.bf16.msra.mxu0 %v1955_v36  ;;  %1988 = vmatpush3.bf16.msra.mxu1 %v1985_v29  ;;  %v655_v53 = vld [vmem:[%s2546_s19 + $0xc8] sm:$0xff]  ;;  %v670_v54 = vld [vmem:[%s2546_s19 + $0x140] sm:$0xff]  ;;  %v1963_v57 = vpack.c.bf16 %v637_v51, %v636_v50  ;;  %v656_v63 = vld [vmem:[%s2546_s19 + $0xd0] sm:$0xff]  ;;  %vm522_vm3 = vcmp.lt.s32.totalorder %v514_v34, 15 }
  0x68   : > { %1958 = vmatprep.subr.bf16.mxu0 %v1957_v37  ;;  %1990 = vmatprep.subr.bf16.mxu1 %v1989_v38  ;;  %v671_v55 = vld [vmem:[%s2546_s19 + $0x148] sm:$0xff]  ;;  %v1965_v59 = vpack.c.bf16 %v655_v53, %v654_v52  ;;  %v638_v61 = vld [vmem:[%s2546_s19 + $0x40] sm:$0xff]  ;;  %v657_v0 = vld [vmem:[%s2546_s19 + $0xd8] sm:$0xff]  ;;  %v2709_v52 = vsel %vm522_vm3, 1.0, %v2348_v3 }
  0x69   : > { %v1997_v60 = vpack.c.bf16 %v671_v55, %v670_v54  ;;  %v639_v62 = vld [vmem:[%s2546_s19 + $0x48] sm:$0xff]  ;;  %v672_v1 = vld [vmem:[%s2546_s19 + $0x150] sm:$0xff]  ;;  %v673_v2 = vld [vmem:[%s2546_s19 + $0x158] sm:$0xff]  ;;  %v1969_v6 = vpack.c.bf16 %v657_v0, %v656_v63 }
  0x6a   : > { %564 = vperm.xlu1 %2156, %v510_v45   ;;  %559 = vperm.xlu0 %2155, %v509_v46   ;;  %v1967_v5 = vpack.c.bf16 %v639_v62, %v638_v61  ;;  %v2001_v7 = vpack.c.bf16 %v673_v2, %v672_v1  ;;  %v640_v8 = vld [vmem:[%s2546_s19 + $0x50] sm:$0xff]  ;;  %v641_v9 = vld [vmem:[%s2546_s19 + $0x58] sm:$0xff]  ;;  %v658_v10 = vld [vmem:[%s2546_s19 + $0xe0] sm:$0xff] }
  0x6b   : > { %1960 = vmatpush3.bf16.msra.mxu0 %v1959_v47  ;;  %1992 = vmatpush3.bf16.msra.mxu1 %v1989_v38  ;;  %v659_v11 = vld [vmem:[%s2546_s19 + $0xe8] sm:$0xff]  ;;  %v674_v12 = vld [vmem:[%s2546_s19 + $0x160] sm:$0xff]  ;;  %v1971_v14 = vpack.c.bf16 %v641_v9, %v640_v8  ;;  %v660_v19 = vld [vmem:[%s2546_s19 + $0xf0] sm:$0xff] }
  0x6c   : > { %1962 = vmatprep.subr.bf16.mxu0 %v1961_v48  ;;  %1994 = vmatprep.subr.bf16.mxu1 %v1993_v49  ;;  %v675_v13 = vld [vmem:[%s2546_s19 + $0x168] sm:$0xff]  ;;  %v1973_v15 = vpack.c.bf16 %v659_v11, %v658_v10  ;;  %v642_v17 = vld [vmem:[%s2546_s19 + $0x60] sm:$0xff]  ;;  %v661_v20 = vld [vmem:[%s2546_s19 + $0xf8] sm:$0xff]  ;;  %v2704_v48 = vsel %vm515_vm2, 1.0, %v2348_v3 }
  0x6d   : > { %v2005_v16 = vpack.c.bf16 %v675_v13, %v674_v12  ;;  %v643_v18 = vld [vmem:[%s2546_s19 + $0x68] sm:$0xff]  ;;  %v676_v21 = vld [vmem:[%s2546_s19 + $0x170] sm:$0xff]  ;;  %v677_v22 = vld [vmem:[%s2546_s19 + $0x178] sm:$0xff]  ;;  %v1977_v24 = vpack.c.bf16 %v661_v20, %v660_v19 }
  0x6e   : > { %v1975_v23 = vpack.c.bf16 %v643_v18, %v642_v17  ;;  %v2009_v25 = vpack.c.bf16 %v677_v22, %v676_v21  ;;  %v644_v26 = vld [vmem:[%s2546_s19 + $0x70] sm:$0xff]  ;;  %v645_v27 = vld [vmem:[%s2546_s19 + $0x78] sm:$0xff]  ;;  %v497_v29 = vld [vmem:[#allocation7 + $0x8] sm:$0xff] }
  0x6f   : > { %1964 = vmatpush3.bf16.msra.mxu0 %v1963_v57  ;;  %1996 = vmatpush3.bf16.msra.mxu1 %v1993_v49  ;;  %v1979_v28 = vpack.c.bf16 %v645_v27, %v644_v26  ;;  %v496_v30 = vld [vmem:[#allocation7] sm:$0xff]  ;;  %v498_v37 = vld [vmem:[#allocation7 + $0x10] sm:$0xff]  ;;  %v503_v38 = vld [vmem:[#allocation7 + $0x38] sm:$0xff] }
  0x70   : > { %1966 = vmatprep.subr.bf16.mxu0 %v1965_v59  ;;  %1998 = vmatprep.subr.bf16.mxu1 %v1997_v60  ;;  %v500_v46 = vld [vmem:[#allocation7 + $0x20] sm:$0xff]  ;;  %v499_v47 = vld [vmem:[#allocation7 + $0x18] sm:$0xff]  ;;  %v502_v59 = vld [vmem:[#allocation7 + $0x30] sm:$0xff] }
  0x73   : > { %1968 = vmatpush3.bf16.msra.mxu0 %v1967_v5  ;;  %2000 = vmatpush3.bf16.msra.mxu1 %v1997_v60  ;;  %v501_v60 = vld [vmem:[#allocation7 + $0x28] sm:$0xff] }
  0x74   : > { %1970 = vmatprep.subr.bf16.mxu0 %v1969_v6  ;;  %2002 = vmatprep.subr.bf16.mxu1 %v2001_v7 }
  0x77   : > { %1972 = vmatpush3.bf16.msra.mxu0 %v1971_v14  ;;  %2004 = vmatpush3.bf16.msra.mxu1 %v2001_v7 }
  0x78   : > { %1974 = vmatprep.subr.bf16.mxu0 %v1973_v15  ;;  %2006 = vmatprep.subr.bf16.mxu1 %v2005_v16 }
  0x7b   : > { %1976 = vmatpush3.bf16.msra.mxu0 %v1975_v23  ;;  %2008 = vmatpush3.bf16.msra.mxu1 %v2005_v16 }
  0x7c   : > { %1978 = vmatprep.subr.bf16.mxu0 %v1977_v24  ;;  %2010 = vmatprep.subr.bf16.mxu1 %v2009_v25 }
  0x7f   : > { %1980 = vmatpush3.bf16.msra.mxu0 %v1979_v28  ;;  %2012 = vmatpush3.bf16.msra.mxu1 %v2009_v25 }
  0xdd   : > { %v2680_v32 = vpop.permute.xlu1 %539  ;;  %v2682_v33 = vpop.permute.xlu0 %534 }
  0xde   : > { %v573_v35 = vmul.f32 %v2680_v32, %v497_v29  ;;  %v2687_v36 = vmul.f32 %v2682_v33, %v496_v30 }
  0xe0   : > { %742 = vmatprep.mubr.f32.mxu0 %v2687_v36  ;;  %v605_v39 = vrot.slane %v2687_v36, 1  ;;  %v606_v40 = vrot.slane %v573_v35, 1  ;;  %v580_v49 = vrot.slane %v2687_v36, 7  ;;  %v581_v63 = vrot.slane %v573_v35, 7 }
  0xe1   : > { %v2693_v41 = vpop.permute.xlu1 %544  ;;  %v2695_v42 = vpop.permute.xlu0 %569 }
  0xe2   : > { %v574_v43 = vmul.f32 %v2693_v41, %v498_v37  ;;  %v2699_v44 = vmul.f32 %v2695_v42, %v503_v38  ;;  %v620_v45 = vsel %vm613_vm1, %v605_v39, %v606_v40  ;;  %v595_v10 = vsel %vm588_vm4, %v580_v49, %v581_v63 }
  0xe3   : > { %1893 = vmatprep.mubr.f32.mxu1 %v620_v45 }
  0xe4   : > { %v607_v50 = vrot.slane %v574_v43, 1  ;;  %v587_v51 = vrot.slane %v2699_v44, 7  ;;  %v582_v0 = vrot.slane %v574_v43, 7  ;;  %v612_v15 = vrot.slane %v2699_v44, 1 }
  0xe5   : > { %v2711_v53 = vpop.permute.xlu1 %554  ;;  %v2713_v54 = vpop.permute.xlu0 %549 }
  0xe6   : > { %v576_v55 = vmul.f32 %v2711_v53, %v500_v46  ;;  %v575_v56 = vmul.f32 %v2713_v54, %v499_v47  ;;  %v596_v57 = vsel %vm588_vm4, %v587_v51, %v580_v49  ;;  %v619_v58 = vsel %vm613_vm1, %v606_v40, %v607_v50 }
  0xe7   : > { %v597_v61 = vmul.f32 %v2704_v48, %v596_v57  ;;  %v623_v62 = vmul.f32 %v2709_v52, %v619_v58  ;;  %v594_v14 = vsel %vm588_vm4, %v581_v63, %v582_v0  ;;  %v621_v22 = vsel %vm613_vm1, %v612_v15, %v605_v39 }
  0xe8   : > { %v609_v1 = vrot.slane %v576_v55, 1  ;;  %v608_v2 = vrot.slane %v575_v56, 1  ;;  %v599_v18 = vmul.f32 %v2704_v48, %v594_v14  ;;  %v584_v20 = vrot.slane %v576_v55, 7 }
  0xe9   : > { %v2726_v3 = vpop.permute.xlu1 %564  ;;  %v2728_v5 = vpop.permute.xlu0 %559  ;;  %743 = vmatmul.mubr.f32.vlgmr.msra.gmra.mrb[0].mxu0 %v597_v61  ;;  %1894 = vmatmul.mubr.f32.vlgmr.msra.gmra.mrb[0].mxu1 %v623_v62  ;;  %v583_v21 = vrot.slane %v575_v56, 7  ;;  %v629_v24 = vmul.f32 %v2709_v52, %v621_v22 }
  0xea   : > { %v578_v6 = vmul.f32 %v2726_v3, %v502_v59  ;;  %v577_v7 = vmul.f32 %v2728_v5, %v501_v60  ;;  %747 = vmatprep.mubr.f32.mxu0 %v573_v35  ;;  %v618_v8 = vsel %vm613_vm1, %v607_v50, %v608_v2  ;;  %v617_v9 = vsel %vm613_vm1, %v608_v2, %v609_v1 }
  0xeb   : > { %1896 = vmatprep.mubr.f32.mxu1 %v618_v8  ;;  %v625_v11 = vmul.f32 %v2709_v52, %v617_v9  ;;  %v593_v25 = vsel %vm588_vm4, %v582_v0, %v583_v21  ;;  %v592_v26 = vsel %vm588_vm4, %v583_v21, %v584_v20 }
  0xec   : > { %v611_v12 = vrot.slane %v578_v6, 1  ;;  %v610_v13 = vrot.slane %v577_v7, 1  ;;  %v601_v27 = vmul.f32 %v2704_v48, %v592_v26  ;;  %v586_v28 = vrot.slane %v578_v6, 7 }
  0xed   : > { %748 = vmatmul.mubr.f32.gmra.mrb[2].mxu0 %v595_v10  ;;  %1897 = vmatmul.mubr.f32.gmra.mrb[2].mxu1 %v625_v11  ;;  %v585_v29 = vrot.slane %v577_v7, 7 }
  0xee   : > { %752 = vmatprep.mubr.f32.mxu0 %v574_v43  ;;  %v616_v16 = vsel %vm613_vm1, %v609_v1, %v610_v13  ;;  %v615_v17 = vsel %vm613_vm1, %v610_v13, %v611_v12  ;;  %v614_v23 = vsel %vm613_vm1, %v611_v12, %v612_v15  ;;  %v589_v36 = vsel %vm588_vm4, %v586_v28, %v587_v51 }
  0xef   : > { %1899 = vmatprep.mubr.f32.mxu1 %v616_v16  ;;  %v627_v19 = vmul.f32 %v2709_v52, %v615_v17  ;;  %v591_v30 = vsel %vm588_vm4, %v584_v20, %v585_v29  ;;  %v590_v34 = vsel %vm588_vm4, %v585_v29, %v586_v28 }
  0xf0   : > { %v603_v35 = vmul.f32 %v2704_v48, %v590_v34 }
  0xf1   : > { %753 = vmatmul.mubr.f32.gmra.mrb[4].mxu0 %v599_v18  ;;  %1900 = vmatmul.mubr.f32.gmra.mrb[4].mxu1 %v627_v19 }
  0xf2   : > { %757 = vmatprep.mubr.f32.mxu0 %v575_v56  ;;  %1902 = vmatprep.mubr.f32.mxu1 %v614_v23 }
  0xf5   : > { %758 = vmatmul.mubr.f32.gmra.mrb[6].mxu0 %v593_v25  ;;  %1903 = vmatmul.mubr.f32.gmra.mrb[6].mxu1 %v629_v24 }
  0xf6   : > { %762 = vmatprep.mubr.f32.mxu0 %v576_v55 }
  0xf9   : > { %763 = vmatmul.mubr.f32.gmra.mrb[8].mxu0 %v601_v27 }
  0xfa   : > { %767 = vmatprep.mubr.f32.mxu0 %v577_v7 }
  0xfd   : > { %768 = vmatmul.mubr.f32.gmra.mrb[10].mxu0 %v591_v30 }
  0xfe   : > { %772 = vmatprep.mubr.f32.mxu0 %v578_v6 }
 0x101   : > { %773 = vmatmul.mubr.f32.gmra.mrb[12].mxu0 %v603_v35 }
 0x102   : > { %777 = vmatprep.mubr.f32.mxu0 %v2699_v44 }
 0x105   : > { %778 = vmatmul.mubr.f32.gmra.mrb[14].mxu0 %v589_v36 }
 0x1bc   : > { %v1733_v37 = vpop.f32.mrb[0].mxu0  ;;  %v1895_v38 = vpop.f32.mrb[0].mxu1 }
 0x1bd   : > { %v1734_v39 = vpop.f32.mrb[1].mxu0  ;;  %v849_v40 = vpop.f32.mrb[1].mxu1 }
 0x1be   : > { %v1735_v43 = vadd.f32 %v1734_v39, %v1733_v37 }
 0x1c0   : > { %v2768_v45 = vadd.f32 %v1735_v43, %v849_v40  ;;  %v1736_v46 = vpop.f32.mrb[2].mxu0  ;;  %v1898_v47 = vpop.f32.mrb[2].mxu1 }
 0x1c1   : > { %v1737_v49 = vpop.f32.mrb[3].mxu0  ;;  %v859_v50 = vpop.f32.mrb[3].mxu1 }
 0x1c2   : > { %v1738_v55 = vadd.f32 %v1737_v49, %v1736_v46  ;;  %890 = vadd.xlane.f32.xlu0 %v2768_v45 }
 0x1c4   : > { %v2771_v56 = vadd.f32 %v1895_v38, %v1738_v55  ;;  %v1739_v44 = vpop.f32.mrb[4].mxu0  ;;  %v1901_v57 = vpop.f32.mrb[4].mxu1 }
 0x1c5   : > { %v1740_v51 = vpop.f32.mrb[5].mxu0  ;;  %v869_v58 = vpop.f32.mrb[5].mxu1 }
 0x1c6   : > { %v1741_v59 = vadd.f32 %v1740_v51, %v1739_v44  ;;  %892 = vadd.xlane.f32.xlu0 %v2771_v56 }
 0x1c8   : > { %v2774_v60 = vadd.f32 %v1741_v59, %v859_v50  ;;  %v1742_v61 = vpop.f32.mrb[6].mxu0  ;;  %v1904_v62 = vpop.f32.mrb[6].mxu1 }
 0x1c9   : > { %v1743_v63 = vpop.f32.mrb[7].mxu0  ;;  %v879_v0 = vpop.f32.mrb[7].mxu1 }
 0x1ca   : > { %v1744_v1 = vadd.f32 %v1743_v63, %v1742_v61  ;;  %894 = vadd.xlane.f32.xlu0 %v2774_v60 }
 0x1cc   : > { %v2777_v2 = vadd.f32 %v1898_v47, %v1744_v1  ;;  %v1745_v6 = vpop.f32.mrb[8].mxu0 }
 0x1cd   : > { %v1746_v7 = vpop.f32.mrb[9].mxu0 }
 0x1ce   : > { %v1747_v8 = vadd.f32 %v1746_v7, %v1745_v6 }
 0x1d0   : > { %v2779_v9 = vadd.f32 %v1747_v8, %v869_v58  ;;  %v1748_v10 = vpop.f32.mrb[10].mxu0 }
 0x1d1   : > { %v1749_v11 = vpop.f32.mrb[11].mxu0 }
 0x1d2   : > { %v1750_v12 = vadd.f32 %v1749_v11, %v1748_v10  ;;  %898 = vadd.xlane.f32.xlu0 %v2779_v9 }
 0x1d4   : > { %v2782_v13 = vadd.f32 %v1901_v57, %v1750_v12  ;;  %v1751_v14 = vpop.f32.mrb[12].mxu0 }
 0x1d5   : > { %v1752_v15 = vpop.f32.mrb[13].mxu0 }
 0x1d6   : > { %v1753_v16 = vadd.f32 %v1752_v15, %v1751_v14  ;;  %v1110_v15 = vld [vmem:[%s2552_s23 + $0x80] sm:$0xff] }
 0x1d8   : > { %v2784_v17 = vadd.f32 %v1753_v16, %v879_v0  ;;  %v1754_v18 = vpop.f32.mrb[14].mxu0  ;;  %v1111_v16 = vld [vmem:[%s2552_s23 + $0x88] sm:$0xff] }
 0x1d9   : > { %v1755_v19 = vpop.f32.mrb[15].mxu0 }
 0x1da   : > { %v1756_v20 = vadd.f32 %v1755_v19, %v1754_v18  ;;  %902 = vadd.xlane.f32.xlu0 %v2784_v17  ;;  %v2013_v18 = vpack.c.bf16 %v1111_v16, %v1110_v15  ;;  %v1132_v15 = vld [vmem:[%s2552_s23 + $0x130] sm:$0xff] }
 0x1dc   : > { %v2787_v21 = vadd.f32 %v1904_v62, %v1756_v20  ;;  %2014 = vmatprep.subr.bf16.mxu0 %v2013_v18  ;;  %v1094_v20 = vld [vmem:[%s2552_s23] sm:$0xff] }
 0x1dd   : > { %v1102_v18 = vld [vmem:[%s2552_s23 + $0x40] sm:$0xff] }
 0x1de   : > { %904 = vadd.xlane.f32.xlu1 %v2787_v21 }
 0x1e2   : > { %896 = vadd.xlane.f32.xlu1 %v2777_v2 }
 0x1e6   : > { %900 = vadd.xlane.f32.xlu1 %v2782_v13 }
 0x24f   : > { %v891_v22 = vpop.xlane.xlu0 %890 }
 0x250   : > { %v2792_v23 = vmul.f32 0.03125, %v891_v22  ;;  %v1095_v22 = vld [vmem:[%s2552_s23 + $0x8] sm:$0xff] }
 0x252   : > { %v914_v24 = vsub.f32 %v2768_v45, %v2792_v23 }
 0x253   : > { %v893_v25 = vpop.xlane.xlu0 %892 }
 0x254   : > { %v2796_v26 = vmul.f32 0.03125, %v893_v25  ;;  %v922_v27 = vmul.f32 %v2662_v4, %v914_v24  ;;  %v2015_v24 = vpack.c.bf16 %v1095_v22, %v1094_v20  ;;  %v1112_v25 = vld [vmem:[%s2552_s23 + $0x90] sm:$0xff]  ;;  %v1133_v20 = vld [vmem:[%s2552_s23 + $0x138] sm:$0xff] }
 0x256   : > { %v915_v28 = vsub.f32 %v2771_v56, %v2796_v26  ;;  %v930_v29 = vmul.f32 %v922_v27, %v922_v27  ;;  %2016 = vmatpush3.bf16.msra.mxu0 %v2015_v24  ;;  %v1113_v27 = vld [vmem:[%s2552_s23 + $0x98] sm:$0xff]  ;;  %v2057_v24 = vpack.c.bf16 %v1133_v20, %v1132_v15 }
 0x257   : > { %v895_v35 = vpop.xlane.xlu0 %894 }
 0x258   : > { %938 = vadd.xlane.f32.xlu1 %v930_v29  ;;  %v923_v30 = vmul.f32 %v2662_v4, %v915_v28  ;;  %v2802_v36 = vmul.f32 0.03125, %v895_v35  ;;  %v1126_v28 = vld [vmem:[%s2552_s23 + $0x100] sm:$0xff]  ;;  %v2017_v29 = vpack.c.bf16 %v1113_v27, %v1112_v25  ;;  %v1127_v35 = vld [vmem:[%s2552_s23 + $0x108] sm:$0xff]  ;;  %v1120_v25 = vld [vmem:[%s2552_s23 + $0xd0] sm:$0xff] }
 0x259   : > { %v1121_v27 = vld [vmem:[%s2552_s23 + $0xd8] sm:$0xff] }
 0x25a   : > { %v931_v34 = vmul.f32 %v923_v30, %v923_v30  ;;  %v916_v40 = vsub.f32 %v2774_v60, %v2802_v36  ;;  %v1096_v30 = vld [vmem:[%s2552_s23 + $0x10] sm:$0xff]  ;;  %2018 = vmatprep.subr.bf16.mxu0 %v2017_v29  ;;  %v2033_v29 = vpack.c.bf16 %v1121_v27, %v1120_v25  ;;  %v2885_v25 = vld [vmem:[%s3176_s17] ss:$0 sm:$0xff] }
 0x25c   : > { %940 = vadd.xlane.f32.xlu1 %v931_v34  ;;  %v924_v44 = vmul.f32 %v2662_v4, %v916_v40  ;;  %v1097_v34 = vld [vmem:[%s2552_s23 + $0x18] sm:$0xff]  ;;  %v1114_v40 = vld [vmem:[%s2552_s23 + $0xa0] sm:$0xff] }
 0x25e   : > { %v932_v0 = vmul.f32 %v924_v44, %v924_v44  ;;  %v1099_v44 = vld [vmem:[%s2552_s23 + $0x28] sm:$0xff] }
 0x25f   : > { %v899_v37 = vpop.xlane.xlu0 %898 }
 0x260   : > { %v2808_v43 = vmul.f32 0.03125, %v899_v37  ;;  %v2019_v37 = vpack.c.bf16 %v1097_v34, %v1096_v30  ;;  %v1104_v30 = vld [vmem:[%s2552_s23 + $0x50] sm:$0xff]  ;;  %v1105_v34 = vld [vmem:[%s2552_s23 + $0x58] sm:$0xff] }
 0x262   : > { %v918_v57 = vsub.f32 %v2779_v9, %v2808_v43  ;;  %2020 = vmatpush3.bf16.msra.mxu0 %v2019_v37  ;;  %v2035_v37 = vpack.c.bf16 %v1105_v34, %v1104_v30 }
 0x264   : > { %v926_v8 = vmul.f32 %v2662_v4, %v918_v57  ;;  %v1129_v57 = vld [vmem:[%s2552_s23 + $0x118] sm:$0xff] }
 0x266   : > { %v934_v12 = vmul.f32 %v926_v8, %v926_v8  ;;  %v1131_v8 = vld [vmem:[%s2552_s23 + $0x128] sm:$0xff] }
 0x267   : > { %v903_v47 = vpop.xlane.xlu0 %902 }
 0x268   : > { %v2818_v51 = vmul.f32 0.03125, %v903_v47  ;;  %v1128_v47 = vld [vmem:[%s2552_s23 + $0x110] sm:$0xff] }
 0x26a   : > { %v920_v1 = vsub.f32 %v2784_v17, %v2818_v51 }
 0x26b   : > { %v905_v38 = vpop.xlane.xlu1 %904 }
 0x26c   : > { %v2804_v39 = vmul.f32 0.03125, %v905_v38  ;;  %v928_v14 = vmul.f32 %v2662_v4, %v920_v1  ;;  %v2045_v38 = vpack.c.bf16 %v1127_v35, %v1126_v28  ;;  %v1134_v28 = vld [vmem:[%s2552_s23 + $0x140] sm:$0xff]  ;;  %v1135_v35 = vld [vmem:[%s2552_s23 + $0x148] sm:$0xff] }
 0x26e   : > { %v921_v46 = vsub.f32 %v2787_v21, %v2804_v39  ;;  %v936_v19 = vmul.f32 %v928_v14, %v928_v14  ;;  %2046 = vmatprep.subr.bf16.mxu1 %v2045_v38  ;;  %v1119_v14 = vld [vmem:[%s2552_s23 + $0xc8] sm:$0xff] }
 0x26f   : > { %v897_v49 = vpop.xlane.xlu1 %896  ;;  %2048 = vmatpush3.bf16.msra.mxu1 %v2045_v38  ;;  %v2061_v38 = vpack.c.bf16 %v1135_v35, %v1134_v28 }
 0x270   : > { %v2812_v50 = vmul.f32 0.03125, %v897_v49  ;;  %v929_v55 = vmul.f32 %v2662_v4, %v921_v46  ;;  %v1115_v46 = vld [vmem:[%s2552_s23 + $0xa8] sm:$0xff] }
 0x271   : > { %v2021_v49 = vpack.c.bf16 %v1115_v46, %v1114_v40  ;;  %v1122_v40 = vld [vmem:[%s2552_s23 + $0xe0] sm:$0xff]  ;;  %v1123_v46 = vld [vmem:[%s2552_s23 + $0xe8] sm:$0xff] }
 0x272   : > { %v917_v58 = vsub.f32 %v2777_v2, %v2812_v50  ;;  %v937_v59 = vmul.f32 %v929_v55, %v929_v55  ;;  %v1098_v55 = vld [vmem:[%s2552_s23 + $0x20] sm:$0xff] }
 0x273   : > { %v901_v61 = vpop.xlane.xlu1 %900  ;;  %2022 = vmatprep.subr.bf16.mxu0 %v2021_v49  ;;  %v2037_v49 = vpack.c.bf16 %v1123_v46, %v1122_v40 }
 0x274   : > { %v2822_v62 = vmul.f32 0.03125, %v901_v61  ;;  %952 = vadd.xlane.f32.xlu0 %v937_v59  ;;  %v925_v63 = vmul.f32 %v2662_v4, %v917_v58  ;;  %v2023_v58 = vpack.c.bf16 %v1099_v44, %v1098_v55  ;;  %v2049_v59 = vpack.c.bf16 %v1129_v57, %v1128_v47  ;;  %v1116_v61 = vld [vmem:[%s2552_s23 + $0xb0] sm:$0xff]  ;;  %v1106_v55 = vld [vmem:[%s2552_s23 + $0x60] sm:$0xff]  ;;  %v1107_v44 = vld [vmem:[%s2552_s23 + $0x68] sm:$0xff] }
 0x275   : > { %v1136_v47 = vld [vmem:[%s2552_s23 + $0x150] sm:$0xff]  ;;  %v1137_v57 = vld [vmem:[%s2552_s23 + $0x158] sm:$0xff] }
 0x276   : > { %v919_v6 = vsub.f32 %v2782_v13, %v2822_v62  ;;  %v933_v7 = vmul.f32 %v925_v63, %v925_v63  ;;  %2024 = vmatpush3.bf16.msra.mxu0 %v2023_v58  ;;  %2050 = vmatprep.subr.bf16.mxu1 %v2049_v59  ;;  %v1117_v63 = vld [vmem:[%s2552_s23 + $0xb8] sm:$0xff]  ;;  %v2039_v58 = vpack.c.bf16 %v1107_v44, %v1106_v55 }
 0x277   : > { %2052 = vmatpush3.bf16.msra.mxu1 %v2049_v59  ;;  %v2025_v1 = vpack.c.bf16 %v1117_v63, %v1116_v61  ;;  %v2065_v59 = vpack.c.bf16 %v1137_v57, %v1136_v47  ;;  %v1124_v61 = vld [vmem:[%s2552_s23 + $0xf0] sm:$0xff]  ;;  %v1125_v63 = vld [vmem:[%s2552_s23 + $0xf8] sm:$0xff] }
 0x278   : > { %944 = vadd.xlane.f32.xlu1 %v933_v7  ;;  %942 = vadd.xlane.f32.xlu0 %v932_v0  ;;  %v927_v10 = vmul.f32 %v2662_v4, %v919_v6  ;;  %v1130_v0 = vld [vmem:[%s2552_s23 + $0x120] sm:$0xff]  ;;  %v1100_v6 = vld [vmem:[%s2552_s23 + $0x30] sm:$0xff]  ;;  %v1101_v7 = vld [vmem:[%s2552_s23 + $0x38] sm:$0xff] }
 0x279   : > { %2026 = vmatprep.subr.bf16.mxu0 %v2025_v1  ;;  %v2041_v1 = vpack.c.bf16 %v1125_v63, %v1124_v61 }
 0x27a   : > { %v935_v11 = vmul.f32 %v927_v10, %v927_v10  ;;  %v2027_v10 = vpack.c.bf16 %v1101_v7, %v1100_v6  ;;  %v1108_v6 = vld [vmem:[%s2552_s23 + $0x70] sm:$0xff]  ;;  %v1109_v7 = vld [vmem:[%s2552_s23 + $0x78] sm:$0xff] }
 0x27c   : > { %948 = vadd.xlane.f32.xlu1 %v935_v11  ;;  %946 = vadd.xlane.f32.xlu0 %v934_v12  ;;  %v2053_v11 = vpack.c.bf16 %v1131_v8, %v1130_v0  ;;  %v1118_v12 = vld [vmem:[%s2552_s23 + $0xc0] sm:$0xff]  ;;  %v1139_v8 = vld [vmem:[%s2552_s23 + $0x168] sm:$0xff] }
 0x27d   : > { %2028 = vmatpush3.bf16.msra.mxu0 %v2027_v10  ;;  %v2029_v16 = vpack.c.bf16 %v1119_v14, %v1118_v12  ;;  %v1138_v0 = vld [vmem:[%s2552_s23 + $0x160] sm:$0xff]  ;;  %v2043_v10 = vpack.c.bf16 %v1109_v7, %v1108_v6  ;;  %v1140_v12 = vld [vmem:[%s2552_s23 + $0x170] sm:$0xff]  ;;  %v1141_v14 = vld [vmem:[%s2552_s23 + $0x178] sm:$0xff] }
 0x27e   : > { %2054 = vmatprep.subr.bf16.mxu1 %v2053_v11  ;;  %v2073_v15 = vpack.c.bf16 %v1141_v14, %v1140_v12 }
 0x27f   : > { %2056 = vmatpush3.bf16.msra.mxu1 %v2053_v11  ;;  %2030 = vmatprep.subr.bf16.mxu0 %v2029_v16  ;;  %v2069_v11 = vpack.c.bf16 %v1139_v8, %v1138_v0 }
 0x280   : > { %950 = vadd.xlane.f32.xlu0 %v936_v19  ;;  %v1103_v19 = vld [vmem:[%s2552_s23 + $0x48] sm:$0xff]  ;;  %2058 = vmatprep.subr.bf16.mxu1 %v2057_v24 }
 0x281   : > { %v2031_v22 = vpack.c.bf16 %v1103_v19, %v1102_v18 }
 0x283   : > { %2032 = vmatpush3.bf16.msra.mxu0 %v2031_v22  ;;  %2060 = vmatpush3.bf16.msra.mxu1 %v2057_v24 }
 0x284   : > { %2034 = vmatprep.subr.bf16.mxu0 %v2033_v29  ;;  %2062 = vmatprep.subr.bf16.mxu1 %v2061_v38  ;;  %v2893_v29 = vld [vmem:[%s468_s26] ss:$0 sm:$0xff] }
 0x287   : > { %2036 = vmatpush3.bf16.msra.mxu0 %v2035_v37  ;;  %2064 = vmatpush3.bf16.msra.mxu1 %v2061_v38 }
 0x288   : > { %2038 = vmatprep.subr.bf16.mxu0 %v2037_v49  ;;  %2066 = vmatprep.subr.bf16.mxu1 %v2065_v59 }
 0x28b   : > { %2040 = vmatpush3.bf16.msra.mxu0 %v2039_v58  ;;  %2068 = vmatpush3.bf16.msra.mxu1 %v2065_v59 }
 0x28c   : > { %2042 = vmatprep.subr.bf16.mxu0 %v2041_v1  ;;  %2070 = vmatprep.subr.bf16.mxu1 %v2069_v11 }
 0x28f   : > { %2044 = vmatpush3.bf16.msra.mxu0 %v2043_v10  ;;  %2072 = vmatpush3.bf16.msra.mxu1 %v2069_v11 }
 0x290   : > { %2074 = vmatprep.subr.bf16.mxu1 %v2073_v15 }
 0x293   : > { %2076 = vmatpush3.bf16.msra.mxu1 %v2073_v15 }
 0x2e5   : > { %v939_v16 = vpop.xlane.xlu1 %938 }
 0x2e6   : > { %v954_v18 = vmul.f32 0.03125, %v939_v16 }
 0x2e8   : > { %v962_v19 = vadd.f32 1e-05, %v954_v18 }
 0x2e9   : > { %v941_v20 = vpop.xlane.xlu1 %940 }
 0x2ea   : > { %2157 = vrsqrt.f32 %v962_v19  ;;  %v955_v22 = vmul.f32 0.03125, %v941_v20 }
 0x2ec   : > { %v963_v24 = vadd.f32 1e-05, %v955_v22 }
 0x2ee   : > { %2159 = vrsqrt.f32 %v963_v24 }
 0x2f4   : > { %v2158_v27 = vpop.eup %2157 }
 0x2f5   : > { %v984_v28 = vmul.f32 %v2158_v27, %v2885_v25 }
 0x2f7   : > { %v992_v30 = vmul.f32 %v984_v28, %v2792_v23  ;;  %v1014_v38 = vmul.f32 %v984_v28, %v2768_v45 }
 0x2f8   : > { %v2160_v34 = vpop.eup %2159 }
 0x2f9   : > { %v985_v35 = vmul.f32 %v2160_v34, %v2885_v25  ;;  %v1006_v37 = vsub.f32 %v2893_v29, %v992_v30 }
 0x2fb   : > { %v993_v40 = vmul.f32 %v985_v35, %v2796_v26  ;;  %v1022_v46 = vadd.f32 %v1014_v38, %v1006_v37  ;;  %v1015_v47 = vmul.f32 %v985_v35, %v2771_v56 }
 0x2fd   : > { %v1030_v49 = vmax.f32 %v1022_v46, 0.0  ;;  %v1007_v55 = vsub.f32 %v2893_v29, %v993_v40 }
 0x2ff   : > { %v2903_v44 = vmul.f32 %v1030_v49, %v2682_v33  ;;  %v1023_v57 = vadd.f32 %v1015_v47, %v1007_v55 }
 0x301   : > { %1206 = vmatprep.mubr.f32.mxu0 %v2903_v44  ;;  %v953_v23 = vpop.xlane.xlu0 %952  ;;  %v1031_v58 = vmax.f32 %v1023_v57, 0.0  ;;  %v1070_v56 = vrot.slane %v2903_v44, 1 }
 0x302   : > { %v961_v59 = vmul.f32 0.03125, %v953_v23 }
 0x303   : > { %v2907_v61 = vmul.f32 %v1031_v58, %v2680_v32 }
 0x304   : > { %v969_v45 = vadd.f32 1e-05, %v961_v59 }
 0x305   : > { %v945_v26 = vpop.xlane.xlu1 %944  ;;  %v943_v63 = vpop.xlane.xlu0 %942  ;;  %v1071_v0 = vrot.slane %v2907_v61, 1 }
 0x306   : > { %2161 = vrsqrt.f32 %v969_v45  ;;  %v957_v1 = vmul.f32 0.03125, %v945_v26  ;;  %v956_v33 = vmul.f32 0.03125, %v943_v63  ;;  %v1046_v63 = vrot.slane %v2903_v44, 7 }
 0x307   : > { %v1084_v6 = vsel %vm613_vm1, %v1070_v56, %v1071_v0 }
 0x308   : > { %v965_v7 = vadd.f32 1e-05, %v957_v1  ;;  %v964_v32 = vadd.f32 1e-05, %v956_v33  ;;  %1937 = vmatprep.mubr.f32.mxu1 %v1084_v6 }
 0x309   : > { %v949_v8 = vpop.xlane.xlu1 %948  ;;  %v947_v10 = vpop.xlane.xlu0 %946 }
 0x30a   : > { %2163 = vrsqrt.f32 %v965_v7  ;;  %v959_v11 = vmul.f32 0.03125, %v949_v8  ;;  %v958_v12 = vmul.f32 0.03125, %v947_v10 }
 0x30b   : > { %2165 = vrsqrt.f32 %v964_v32 }
 0x30c   : > { %v967_v14 = vadd.f32 1e-05, %v959_v11  ;;  %v966_v15 = vadd.f32 1e-05, %v958_v12 }
 0x30d   : > { %v951_v16 = vpop.xlane.xlu0 %950 }
 0x30e   : > { %2167 = vrsqrt.f32 %v967_v14  ;;  %v960_v18 = vmul.f32 0.03125, %v951_v16 }
 0x30f   : > { %2169 = vrsqrt.f32 %v966_v15 }
 0x310   : > { %v2162_v19 = vpop.eup %2161  ;;  %v968_v20 = vadd.f32 1e-05, %v960_v18 }
 0x311   : > { %v991_v22 = vmul.f32 %v2162_v19, %v2885_v25 }
 0x312   : > { %2171 = vrsqrt.f32 %v968_v20 }
 0x313   : > { %v999_v24 = vmul.f32 %v991_v22, %v2804_v39  ;;  %v1021_v34 = vmul.f32 %v991_v22, %v2787_v21 }
 0x314   : > { %v2164_v27 = vpop.eup %2163 }
 0x315   : > { %v2166_v28 = vpop.eup %2165  ;;  %v1013_v30 = vsub.f32 %v2893_v29, %v999_v24  ;;  %v987_v35 = vmul.f32 %v2164_v27, %v2885_v25 }
 0x316   : > { %v986_v37 = vmul.f32 %v2166_v28, %v2885_v25 }
 0x317   : > { %v1029_v38 = vadd.f32 %v1021_v34, %v1013_v30  ;;  %v995_v40 = vmul.f32 %v987_v35, %v2812_v50  ;;  %v1017_v39 = vmul.f32 %v987_v35, %v2777_v2 }
 0x318   : > { %v2168_v46 = vpop.eup %2167  ;;  %v994_v47 = vmul.f32 %v986_v37, %v2802_v36  ;;  %v1016_v58 = vmul.f32 %v986_v37, %v2774_v60 }
 0x319   : > { %v2170_v49 = vpop.eup %2169  ;;  %v1037_v55 = vmax.f32 %v1029_v38, 0.0  ;;  %v989_v57 = vmul.f32 %v2168_v46, %v2885_v25  ;;  %v1009_v23 = vsub.f32 %v2893_v29, %v995_v40 }
 0x31a   : > { %v1008_v21 = vsub.f32 %v2893_v29, %v994_v47  ;;  %v988_v59 = vmul.f32 %v2170_v49, %v2885_v25 }
 0x31b   : > { %v2932_v45 = vmul.f32 %v1037_v55, %v2695_v42  ;;  %v997_v50 = vmul.f32 %v989_v57, %v2822_v62  ;;  %v1025_v36 = vadd.f32 %v1017_v39, %v1009_v23  ;;  %v1019_v42 = vmul.f32 %v989_v57, %v2782_v13 }
 0x31c   : > { %v2172_v26 = vpop.eup %2171  ;;  %v1024_v2 = vadd.f32 %v1016_v58, %v1008_v21  ;;  %v996_v1 = vmul.f32 %v988_v59, %v2808_v43  ;;  %v1018_v62 = vmul.f32 %v988_v59, %v2779_v9  ;;  %v1047_v9 = vrot.slane %v2907_v61, 7 }
 0x31d   : > { %v990_v33 = vmul.f32 %v2172_v26, %v2885_v25  ;;  %v1053_v6 = vrot.slane %v2932_v45, 7  ;;  %v1033_v7 = vmax.f32 %v1025_v36, 0.0  ;;  %v1011_v60 = vsub.f32 %v2893_v29, %v997_v50 }
 0x31e   : > { %v1032_v32 = vmax.f32 %v1024_v2, 0.0  ;;  %v1010_v8 = vsub.f32 %v2893_v29, %v996_v1  ;;  %v1060_v24 = vsel %vm588_vm4, %v1046_v63, %v1047_v9  ;;  %v1077_v47 = vrot.slane %v2932_v45, 1 }
 0x31f   : > { %v998_v10 = vmul.f32 %v990_v33, %v2818_v51  ;;  %v1061_v43 = vsel %vm588_vm4, %v1053_v6, %v1046_v63  ;;  %v1041_v25 = vmul.f32 %v1033_v7, %v2713_v54  ;;  %v1027_v15 = vadd.f32 %v1019_v42, %v1011_v60 }
 0x320   : > { %v1040_v11 = vmul.f32 %v1032_v32, %v2693_v41  ;;  %v1062_v12 = vmul.f32 %v2704_v48, %v1061_v43  ;;  %v1026_v14 = vadd.f32 %v1018_v62, %v1010_v8  ;;  %v1020_v16 = vmul.f32 %v990_v33, %v2784_v17 }
 0x321   : > { %v1012_v13 = vsub.f32 %v2893_v29, %v998_v10  ;;  %v1035_v20 = vmax.f32 %v1027_v15, 0.0  ;;  %v1073_v54 = vrot.slane %v1041_v25, 1  ;;  %v1085_v23 = vsel %vm613_vm1, %v1077_v47, %v1070_v56 }
 0x322   : > { %v1072_v51 = vrot.slane %v1040_v11, 1  ;;  %1207 = vmatmul.mubr.f32.vlgmr.msra.gmra.mrb[16].mxu0 %v1062_v12  ;;  %v1048_v18 = vrot.slane %v1040_v11, 7  ;;  %v1034_v19 = vmax.f32 %v1026_v14, 0.0  ;;  %v1093_v59 = vmul.f32 %v2709_v52, %v1085_v23 }
 0x323   : > { %1211 = vmatprep.mubr.f32.mxu0 %v2907_v61  ;;  %v1028_v22 = vadd.f32 %v1020_v16, %v1012_v13  ;;  %v1043_v28 = vmul.f32 %v1035_v20, %v2728_v5  ;;  %v1049_v5 = vrot.slane %v1041_v25, 7 }
 0x324   : > { %v1083_v41 = vsel %vm613_vm1, %v1071_v0, %v1072_v51  ;;  %v1042_v29 = vmul.f32 %v1034_v19, %v2711_v53  ;;  %v1059_v27 = vsel %vm588_vm4, %v1047_v9, %v1048_v18  ;;  %v1082_v61 = vsel %vm613_vm1, %v1072_v51, %v1073_v54 }
 0x325   : > { %v1087_v17 = vmul.f32 %v2709_v52, %v1083_v41  ;;  %v1036_v34 = vmax.f32 %v1028_v22, 0.0  ;;  %v1075_v0 = vrot.slane %v1043_v28, 1  ;;  %v1064_v53 = vmul.f32 %v2704_v48, %v1059_v27 }
 0x326   : > { %1212 = vmatmul.mubr.f32.gmra.mrb[18].mxu0 %v1060_v24  ;;  %v1074_v30 = vrot.slane %v1042_v29, 1  ;;  %v1050_v40 = vrot.slane %v1042_v29, 7  ;;  %v1051_v50 = vrot.slane %v1043_v28, 7 }
 0x327   : > { %1938 = vmatmul.mubr.f32.vlgmr.msra.gmra.mrb[8].mxu1 %v1087_v17  ;;  %1216 = vmatprep.mubr.f32.mxu0 %v1040_v11  ;;  %v1044_v37 = vmul.f32 %v1036_v34, %v2726_v3  ;;  %v1058_v3 = vsel %vm588_vm4, %v1048_v18, %v1049_v5 }
 0x328   : > { %1940 = vmatprep.mubr.f32.mxu1 %v1082_v61  ;;  %v1081_v35 = vsel %vm613_vm1, %v1073_v54, %v1074_v30  ;;  %v1080_v49 = vsel %vm613_vm1, %v1074_v30, %v1075_v0  ;;  %v1057_v57 = vsel %vm588_vm4, %v1049_v5, %v1050_v40  ;;  %v1056_v44 = vsel %vm588_vm4, %v1050_v40, %v1051_v50 }
 0x329   : > { %v1089_v38 = vmul.f32 %v2709_v52, %v1081_v35  ;;  %v1076_v46 = vrot.slane %v1044_v37, 1  ;;  %v1066_v58 = vmul.f32 %v2704_v48, %v1057_v57  ;;  %v1052_v36 = vrot.slane %v1044_v37, 7 }
 0x32a   : > { %1217 = vmatmul.mubr.f32.gmra.mrb[20].mxu0 %v1064_v53 }
 0x32b   : > { %1941 = vmatmul.mubr.f32.gmra.mrb[10].mxu1 %v1089_v38  ;;  %1221 = vmatprep.mubr.f32.mxu0 %v1041_v25  ;;  %v1079_v55 = vsel %vm613_vm1, %v1075_v0, %v1076_v46  ;;  %v1078_v21 = vsel %vm613_vm1, %v1076_v46, %v1077_v47  ;;  %v1055_v56 = vsel %vm588_vm4, %v1051_v50, %v1052_v36 }
 0x32c   : > { %1943 = vmatprep.mubr.f32.mxu1 %v1080_v49  ;;  %v1091_v39 = vmul.f32 %v2709_v52, %v1079_v55  ;;  %v1068_v26 = vmul.f32 %v2704_v48, %v1055_v56  ;;  %v1054_v52 = vsel %vm588_vm4, %v1052_v36, %v1053_v6 }
 0x32e   : > { %1222 = vmatmul.mubr.f32.gmra.mrb[22].mxu0 %v1058_v3 }
 0x32f   : > { %1944 = vmatmul.mubr.f32.gmra.mrb[12].mxu1 %v1091_v39  ;;  %1226 = vmatprep.mubr.f32.mxu0 %v1042_v29 }
 0x330   : > { %1946 = vmatprep.mubr.f32.mxu1 %v1078_v21 }
 0x332   : > { %1227 = vmatmul.mubr.f32.gmra.mrb[24].mxu0 %v1066_v58 }
 0x333   : > { %1947 = vmatmul.mubr.f32.gmra.mrb[14].mxu1 %v1093_v59  ;;  %1231 = vmatprep.mubr.f32.mxu0 %v1043_v28 }
 0x336   : > { %1232 = vmatmul.mubr.f32.gmra.mrb[26].mxu0 %v1056_v44 }
 0x337   : > { %1236 = vmatprep.mubr.f32.mxu0 %v1044_v37 }
 0x33a   : > { %1237 = vmatmul.mubr.f32.gmra.mrb[28].mxu0 %v1068_v26 }
 0x33b   : > { %1241 = vmatprep.mubr.f32.mxu0 %v2932_v45 }
 0x33e   : > { %1242 = vmatmul.mubr.f32.gmra.mrb[30].mxu0 %v1054_v52 }
 0x3f5   : > { %v1813_v63 = vpop.f32.mrb[16].mxu0 }
 0x3f6   : > { %v1814_v2 = vpop.f32.mrb[17].mxu0 }
 0x3f7   : > { %v1815_v1 = vadd.f32 %v1814_v2, %v1813_v63 }
 0x3f9   : > { %v1816_v33 = vpop.f32.mrb[18].mxu0 }
 0x3fa   : > { %v1939_v7 = vpop.f32.mrb[8].mxu1  ;;  %v1817_v60 = vpop.f32.mrb[19].mxu0 }
 0x3fb   : > { %v1818_v32 = vadd.f32 %v1817_v60, %v1816_v33  ;;  %v1313_v42 = vpop.f32.mrb[9].mxu1 }
 0x3fc   : > { %v3001_v8 = vadd.f32 %v1815_v1, %v1313_v42 }
 0x3fd   : > { %v3003_v48 = vadd.f32 %v1939_v7, %v1818_v32  ;;  %v1819_v62 = vpop.f32.mrb[20].mxu0 }
 0x3fe   : > { %1354 = vadd.xlane.f32.xlu1 %v3001_v8  ;;  %v1942_v45 = vpop.f32.mrb[10].mxu1  ;;  %v1820_v10 = vpop.f32.mrb[21].mxu0 }
 0x3ff   : > { %v1821_v31 = vadd.f32 %v1820_v10, %v1819_v62  ;;  %v1323_v6 = vpop.f32.mrb[11].mxu1  ;;  %1356 = vadd.xlane.f32.xlu0 %v3003_v48 }
 0x401   : > { %v3007_v43 = vadd.f32 %v1821_v31, %v1323_v6  ;;  %v1822_v25 = vpop.f32.mrb[22].mxu0 }
 0x402   : > { %v1945_v11 = vpop.f32.mrb[12].mxu1  ;;  %v1823_v12 = vpop.f32.mrb[23].mxu0 }
 0x403   : > { %v1824_v14 = vadd.f32 %v1823_v12, %v1822_v25  ;;  %v1333_v15 = vpop.f32.mrb[13].mxu1  ;;  %1358 = vadd.xlane.f32.xlu1 %v3007_v43 }
 0x405   : > { %v3010_v13 = vadd.f32 %v1942_v45, %v1824_v14  ;;  %v1825_v16 = vpop.f32.mrb[24].mxu0 }
 0x406   : > { %v1948_v9 = vpop.f32.mrb[14].mxu1  ;;  %v1826_v51 = vpop.f32.mrb[25].mxu0 }
 0x407   : > { %v1827_v18 = vadd.f32 %v1826_v51, %v1825_v16  ;;  %v1343_v19 = vpop.f32.mrb[15].mxu1  ;;  %1360 = vadd.xlane.f32.xlu0 %v3010_v13 }
 0x409   : > { %v3013_v20 = vadd.f32 %v1827_v18, %v1333_v15  ;;  %v1828_v54 = vpop.f32.mrb[26].mxu0 }
 0x40a   : > { %v1829_v22 = vpop.f32.mrb[27].mxu0 }
 0x40b   : > { %v1830_v41 = vadd.f32 %v1829_v22, %v1828_v54  ;;  %1362 = vadd.xlane.f32.xlu1 %v3013_v20 }
 0x40d   : > { %v3016_v29 = vadd.f32 %v1945_v11, %v1830_v41  ;;  %v1831_v17 = vpop.f32.mrb[28].mxu0 }
 0x40e   : > { %v1832_v24 = vpop.f32.mrb[29].mxu0 }
 0x40f   : > { %v1833_v27 = vadd.f32 %v1832_v24, %v1831_v17  ;;  %1364 = vadd.xlane.f32.xlu0 %v3016_v29 }
 0x411   : > { %v3019_v28 = vadd.f32 %v1833_v27, %v1343_v19  ;;  %v1834_v30 = vpop.f32.mrb[30].mxu0 }
 0x412   : > { %v1835_v34 = vpop.f32.mrb[31].mxu0 }
 0x413   : > { %v1836_v61 = vadd.f32 %v1835_v34, %v1834_v30  ;;  %1366 = vadd.xlane.f32.xlu1 %v3019_v28 }
 0x415   : > { %v3022_v0 = vadd.f32 %v1948_v9, %v1836_v61 }
 0x417   : > { %1368 = vadd.xlane.f32.xlu0 %v3022_v0 }
 0x48b   : > { %v1355_v53 = vpop.xlane.xlu1 %1354 }
 0x48c   : > { %v3025_v35 = vmul.f32 0.03125, %v1355_v53  ;;  %v1357_v37 = vpop.xlane.xlu0 %1356 }
 0x48d   : > { %v3027_v38 = vmul.f32 0.03125, %v1357_v37 }
 0x48e   : > { %v1378_v5 = vsub.f32 %v3001_v8, %v3025_v35 }
 0x48f   : > { %v1379_v40 = vsub.f32 %v3003_v48, %v3027_v38 }
 0x490   : > { %v1359_v46 = vpop.xlane.xlu1 %1358  ;;  %v1386_v47 = vmul.f32 %v2662_v4, %v1378_v5 }
 0x491   : > { %v3034_v49 = vmul.f32 0.03125, %v1359_v46  ;;  %v1387_v55 = vmul.f32 %v2662_v4, %v1379_v40  ;;  %v3078_v40 = vld [vmem:[%s474_s13] ss:$0 sm:$0xff]  ;;  %s3177_s13 = sadd.s32 4294967295, %s2341_s10  }
 0x492   : > { %v1394_v3 = vmul.f32 %v1386_v47, %v1386_v47  ;;  %p3113_p4 = scmp.eq.s32.totalorder %s3177_s13, 1 }
 0x493   : > { %v1380_v39 = vsub.f32 %v3007_v43, %v3034_v49  ;;  %v1395_v57 = vmul.f32 %v1387_v55, %v1387_v55 }
 0x494   : > { %1402 = vadd.xlane.f32.xlu1 %v1394_v3  ;;  %v1361_v23 = vpop.xlane.xlu0 %1360 }
 0x495   : > { %v3039_v21 = vmul.f32 0.03125, %v1361_v23  ;;  %1404 = vadd.xlane.f32.xlu0 %v1395_v57  ;;  %v1388_v58 = vmul.f32 %v2662_v4, %v1380_v39 }
 0x497   : > { %v1381_v59 = vsub.f32 %v3010_v13, %v3039_v21  ;;  %v1396_v50 = vmul.f32 %v1388_v58, %v1388_v58 }
 0x498   : > { %v1363_v36 = vpop.xlane.xlu1 %1362 }
 0x499   : > { %v3044_v44 = vmul.f32 0.03125, %v1363_v36  ;;  %1406 = vadd.xlane.f32.xlu1 %v1396_v50  ;;  %v1389_v56 = vmul.f32 %v2662_v4, %v1381_v59 }
 0x49b   : > { %v1382_v26 = vsub.f32 %v3013_v20, %v3044_v44  ;;  %v1397_v52 = vmul.f32 %v1389_v56, %v1389_v56 }
 0x49c   : > { %v1365_v63 = vpop.xlane.xlu0 %1364 }
 0x49d   : > { %v3049_v2 = vmul.f32 0.03125, %v1365_v63  ;;  %1408 = vadd.xlane.f32.xlu0 %v1397_v52  ;;  %v1390_v1 = vmul.f32 %v2662_v4, %v1382_v26 }
 0x49f   : > { %v1383_v33 = vsub.f32 %v3016_v29, %v3049_v2  ;;  %v1398_v7 = vmul.f32 %v1390_v1, %v1390_v1 }
 0x4a0   : > { %v1367_v60 = vpop.xlane.xlu1 %1366 }
 0x4a1   : > { %v3054_v32 = vmul.f32 0.03125, %v1367_v60  ;;  %1410 = vadd.xlane.f32.xlu1 %v1398_v7  ;;  %v1391_v42 = vmul.f32 %v2662_v4, %v1383_v33  ;;  %v2189_v33 = vld [vmem:[#allocation7] sm:$0xff] }
 0x4a3   : > { %v1384_v62 = vsub.f32 %v3019_v28, %v3054_v32  ;;  %v1399_v45 = vmul.f32 %v1391_v42, %v1391_v42  ;;  %v2190_v42 = vld [vmem:[#allocation7 + $0x8] sm:$0xff] }
 0x4a4   : > { %v1369_v10 = vpop.xlane.xlu0 %1368 }
 0x4a5   : > { %v3059_v31 = vmul.f32 0.03125, %v1369_v10  ;;  %1412 = vadd.xlane.f32.xlu0 %v1399_v45  ;;  %v1392_v6 = vmul.f32 %v2662_v4, %v1384_v62 }
 0x4a7   : > { %v1385_v25 = vsub.f32 %v3022_v0, %v3059_v31  ;;  %v1400_v11 = vmul.f32 %v1392_v6, %v1392_v6 }
 0x4a9   : > { %1414 = vadd.xlane.f32.xlu1 %v1400_v11  ;;  %v1393_v12 = vmul.f32 %v2662_v4, %v1385_v25  ;;  %v3070_v4 = vld [vmem:[%s471_s25] ss:$0 sm:$0xff]  ;;  %s1528_s25 = sshll.u32 %s2349_s2, 4  ;;  %s1529_s25 = int_to_ptr.vmem [resolvable:$true] %s1528_s25 }
 0x4aa   : > { %s2257_s27 = scalar_lea.vmem %s1529_s25, 1024  ;;  %p2264_p13 = scmp.lt.s32.totalorder %s1529_s25, %s1529_s25 }
 0x4ab   : > { %v1401_v14 = vmul.f32 %v1393_v12, %v1393_v12  ;;  %p2258_p8 = scmp.ne.s32.totalorder %s1529_s25, %s2257_s27  ;;  %p2265_p3 = scmp.lt.s32.totalorder %s2257_s27, %s2257_s27 }
 0x4ad   : > { %1416 = vadd.xlane.f32.xlu0 %v1401_v14  ;;  %p2259_p1 = pnand %p2258_p8, %p3113_p4  ;;  %p2266_p5 = por %p2265_p3, %p2264_p13 }
 0x4af   : > { %p2260_p2 = pneg %p2259_p1 }
 0x4b1   : > { %p2267_p6 = pnand %p2266_p5, %p2260_p2 }
 0x521   : > { %v1403_v15 = vpop.xlane.xlu1 %1402 }
 0x522   : > { %v1418_v16 = vmul.f32 0.03125, %v1403_v15  ;;  %v1405_v9 = vpop.xlane.xlu0 %1404 }
 0x523   : > { %v1419_v51 = vmul.f32 0.03125, %v1405_v9 }
 0x524   : > { %v1426_v18 = vadd.f32 1e-05, %v1418_v16  ;;  %v2191_v16 = vld [vmem:[#allocation7 + $0x10] sm:$0xff] }
 0x525   : > { %v1427_v19 = vadd.f32 1e-05, %v1419_v51 }
 0x526   : > { %2173 = vrsqrt.f32 %v1426_v18  ;;  %v1407_v54 = vpop.xlane.xlu1 %1406 }
 0x527   : > { %2175 = vrsqrt.f32 %v1427_v19  ;;  %v1420_v22 = vmul.f32 0.03125, %v1407_v54 }
 0x529   : > { %v1428_v41 = vadd.f32 1e-05, %v1420_v22 }
 0x52a   : > { %v1409_v17 = vpop.xlane.xlu0 %1408 }
 0x52b   : > { %2177 = vrsqrt.f32 %v1428_v41  ;;  %v1421_v24 = vmul.f32 0.03125, %v1409_v17 }
 0x52d   : > { %v1429_v27 = vadd.f32 1e-05, %v1421_v24 }
 0x52e   : > { %v1411_v30 = vpop.xlane.xlu1 %1410 }
 0x52f   : > { %2179 = vrsqrt.f32 %v1429_v27  ;;  %v1422_v34 = vmul.f32 0.03125, %v1411_v30 }
 0x530   : > { %v2174_v61 = vpop.eup %2173 }
 0x531   : > { %v2176_v53 = vpop.eup %2175  ;;  %v1448_v37 = vmul.f32 %v2174_v61, %v3070_v4  ;;  %v1430_v5 = vadd.f32 1e-05, %v1422_v34 }
 0x532   : > { %v1449_v46 = vmul.f32 %v2176_v53, %v3070_v4  ;;  %v1413_v47 = vpop.xlane.xlu0 %1412 }
 0x533   : > { %v1456_v55 = vmul.f32 %v1448_v37, %v3025_v35  ;;  %2181 = vrsqrt.f32 %v1430_v5  ;;  %v1423_v3 = vmul.f32 0.03125, %v1413_v47  ;;  %v1478_v58 = vmul.f32 %v1448_v37, %v3001_v8  ;;  %v2193_v37 = vld [vmem:[#allocation7 + $0x20] sm:$0xff] }
 0x534   : > { %v1457_v39 = vmul.f32 %v1449_v46, %v3027_v38  ;;  %v1479_v36 = vmul.f32 %v1449_v46, %v3003_v48 }
 0x535   : > { %v2178_v57 = vpop.eup %2177  ;;  %v1470_v23 = vsub.f32 %v3078_v40, %v1456_v55  ;;  %v1431_v59 = vadd.f32 1e-05, %v1423_v3 }
 0x536   : > { %v1471_v50 = vsub.f32 %v3078_v40, %v1457_v39  ;;  %v1450_v56 = vmul.f32 %v2178_v57, %v3070_v4  ;;  %v1415_v26 = vpop.xlane.xlu1 %1414  ;;  %v2194_v57 = vld [vmem:[#allocation7 + $0x28] sm:$0xff] }
 0x537   : > { %v1486_v52 = vadd.f32 %v1478_v58, %v1470_v23  ;;  %2183 = vrsqrt.f32 %v1431_v59  ;;  %v1424_v35 = vmul.f32 0.03125, %v1415_v26 }
 0x538   : > { %v1487_v63 = vadd.f32 %v1479_v36, %v1471_v50  ;;  %v1458_v1 = vmul.f32 %v1450_v56, %v3034_v49  ;;  %v1480_v45 = vmul.f32 %v1450_v56, %v3007_v43  ;;  %v2195_v56 = vld [vmem:[#allocation7 + $0x30] sm:$0xff] }
 0x539   : > { %v2180_v38 = vpop.eup %2179  ;;  %v1494_v7 = vadd.f32 %v2189_v33, %v1486_v52  ;;  %v1432_v60 = vadd.f32 1e-05, %v1424_v35 }
 0x53a   : > { %v1495_v8 = vadd.f32 %v2190_v42, %v1487_v63  ;;  %v1472_v62 = vsub.f32 %v3078_v40, %v1458_v1  ;;  %v1451_v48 = vmul.f32 %v2180_v38, %v3070_v4  ;;  %v1417_v10 = vpop.xlane.xlu0 %1416 }
 0x53b   : > { %v1502_v6 = vmax.f32 %v1494_v7, 0.0  ;;  %2185 = vrsqrt.f32 %v1432_v60  ;;  %v1425_v25 = vmul.f32 0.03125, %v1417_v10 }
 0x53c   : > { %v1503_v11 = vmax.f32 %v1495_v8, 0.0  ;;  %v1488_v12 = vadd.f32 %v1480_v45, %v1472_v62  ;;  %v1459_v49 = vmul.f32 %v1451_v48, %v3039_v21  ;;  %v1481_v43 = vmul.f32 %v1451_v48, %v3010_v13  ;;  %v2192_v21 = vld [vmem:[#allocation7 + $0x18] sm:$0xff] }
 0x53d   : > { %v2182_v14 = vpop.eup %2181  ;;  %1510 = vst [vmem:[#allocation7] sm:$0xff] %v1502_v6  ;;  %v1433_v15 = vadd.f32 1e-05, %v1425_v25 }
 0x53e   : > { %1511 = vst [vmem:[#allocation7 + $0x8] sm:$0xff] %v1503_v11  ;;  %v1496_v9 = vadd.f32 %v2191_v16, %v1488_v12  ;;  %v1473_v51 = vsub.f32 %v3078_v40, %v1459_v49  ;;  %v1452_v18 = vmul.f32 %v2182_v14, %v3070_v4 }
 0x53f   : > { %2187 = vrsqrt.f32 %v1433_v15 }
 0x540   : > { %v1504_v19 = vmax.f32 %v1496_v9, 0.0  ;;  %v1489_v54 = vadd.f32 %v1481_v43, %v1473_v51  ;;  %v1460_v22 = vmul.f32 %v1452_v18, %v3044_v44  ;;  %v1482_v27 = vmul.f32 %v1452_v18, %v3013_v20 }
 0x541   : > { %v2184_v41 = vpop.eup %2183 }
 0x542   : > { %1512 = vst [vmem:[#allocation7 + $0x10] sm:$0xff] %v1504_v19  ;;  %v1497_v17 = vadd.f32 %v2192_v21, %v1489_v54  ;;  %v1474_v24 = vsub.f32 %v3078_v40, %v1460_v22  ;;  %v1453_v30 = vmul.f32 %v2184_v41, %v3070_v4 }
 0x544   : > { %v1505_v34 = vmax.f32 %v1497_v17, 0.0  ;;  %v1490_v61 = vadd.f32 %v1482_v27, %v1474_v24  ;;  %v1461_v13 = vmul.f32 %v1453_v30, %v3049_v2  ;;  %v1483_v46 = vmul.f32 %v1453_v30, %v3016_v29 }
 0x545   : > { %v2186_v53 = vpop.eup %2185 }
 0x546   : > { %1513 = vst [vmem:[#allocation7 + $0x18] sm:$0xff] %v1505_v34  ;;  %v1498_v5 = vadd.f32 %v2193_v37, %v1490_v61  ;;  %v1475_v44 = vsub.f32 %v3078_v40, %v1461_v13  ;;  %v1454_v47 = vmul.f32 %v2186_v53, %v3070_v4 }
 0x548   : > { %v1506_v55 = vmax.f32 %v1498_v5, 0.0  ;;  %v1491_v3 = vadd.f32 %v1483_v46, %v1475_v44  ;;  %v1462_v20 = vmul.f32 %v1454_v47, %v3054_v32  ;;  %v1484_v58 = vmul.f32 %v1454_v47, %v3019_v28  ;;  %v2196_v28 = vld [vmem:[#allocation7 + $0x38] sm:$0xff] }
 0x549   : > { %v2188_v39 = vpop.eup %2187 }
 0x54a   : > { %1514 = vst [vmem:[#allocation7 + $0x20] sm:$0xff] %v1506_v55  ;;  %v1499_v23 = vadd.f32 %v2194_v57, %v1491_v3  ;;  %v1476_v2 = vsub.f32 %v3078_v40, %v1462_v20  ;;  %v1455_v59 = vmul.f32 %v2188_v39, %v3070_v4 }
 0x54c   : > { %v1507_v50 = vmax.f32 %v1499_v23, 0.0  ;;  %v1492_v36 = vadd.f32 %v1484_v58, %v1476_v2  ;;  %v1463_v29 = vmul.f32 %v1455_v59, %v3059_v31  ;;  %v1485_v52 = vmul.f32 %v1455_v59, %v3022_v0 }
 0x54e   : > { %1515 = vst [vmem:[#allocation7 + $0x28] sm:$0xff] %v1507_v50  ;;  %v1500_v26 = vadd.f32 %v2195_v56, %v1492_v36  ;;  %v1477_v32 = vsub.f32 %v3078_v40, %v1463_v29 }
 0x550   : > { %v1508_v35 = vmax.f32 %v1500_v26, 0.0  ;;  %v1493_v63 = vadd.f32 %v1485_v52, %v1477_v32 }
 0x552   : > { %1516 = vst [vmem:[#allocation7 + $0x30] sm:$0xff] %v1508_v35  ;;  %v1501_v1 = vadd.f32 %v2196_v28, %v1493_v63 }
 0x554   : > { %v1509_v31 = vmax.f32 %v1501_v1, 0.0 }
 0x556   : > { %1517 = vst [vmem:[#allocation7 + $0x38] sm:$0xff] %v1509_v31 }
 0x557   : > { %2270 = shalt.err (!%p2267_p6)
}
 0x558   : > { %s2271_s24 = scalar_lea.hbm %s3165_s8, 1024 }
 0x559   : > { %p2272_p10 = scmp.ne.s32.totalorder %s3165_s8, %s2271_s24  ;;  %p2277_p7 = scmp.lt.u32.totalorder %s2271_s24, %s3165_s8 }
 0x55b   : > { %p2273_p12 = pnand %p2272_p10, %p3113_p4 }
 0x55d   : > { %p2274_p0 = pneg %p2273_p12 }
 0x55f   : > { %p2279_p9 = pnand %p2277_p7, %p2274_p0 }
 0x561   : > { %2282 = shalt.err (!%p2279_p9)
}
 0x562   : > { %s2350_s14 = smov 128   ;;  %s2351_s26 = smov 8  }
 0x563   : > { %2087 = dma.vmem_to_hbm [thread:$0]  (%p3113_p4), %s1529_s25, 1024, %s3165_s8, [#allocation4], %s2350_s14, %s2350_s14, %s2351_s26  }
 0x564   : > { %2316 = dma.done.wait (%p3113_p4), [#allocation4], 1024  }
 0x565   : > { %2318 = vsyncadd (%p3113_p4), [#allocation4], 4294966272 }
 0x566 PF: > { %s25_s10 = sadd.s32 1, %s2341_s10   ;;  %s3179_s27 = smov %s2325_s28 }
 0x567   : > { %p22_p11 = scmp.ge.s32.totalorder %s25_s10, 4   ;;  %s3180_s28 = smov %s2329_s29 }
 0x568   : > { %s3181_s29 = smov %s2444_s16  ;;  %s3182_s30 = smov %s2337_s9 }
 0x569   : > { %s3183_s9 = smov %s3185_s12  ;;  %24 = sbr.rel (!%p22_p11) target bundleno = 9 (0x9), region = 125 }
 0x570   :  { %1544 = vsyncpa [#allocation3], 1 }
 0x571   :  { %1546 = vsyncpa [#allocation3 + $0x1], 1 }
 0x572   :  { %1547 = vsyncpa [#allocation6], 1 }
 0x573   :  { %1549 = vsyncpa [#allocation6 + $0x1], 1 }
 0x574   :  { %1550 = vsyncpa [#allocation4], 1 }
 0x575   :  { %1552 = vsyncpa [#allocation4 + $0x1], 1 }

</bundles_post_ra>
